<compile_context>
chip_gen: v5e
topology: v5e:2x2
jax: 0.10.0
libtpu: 0.0.40
codegen_flags: <defaults>
</compile_context>

<pallas_src>
import math
import numpy as np
import jax
import jax.numpy as jnp
from jax import lax
from jax.experimental import pallas as pl
from jax.experimental.pallas import tpu as pltpu


# ----------------------------------------------------------------------------
# Fused kernel: one grid step = TT timesteps for one batch block of BB rows.
#   xproj  = x_aug @ W_aug                (gate bias folded in via ones column)
#   step:  zg = h @ U_g ; zs = c @ U_s    (two small independent MXU ops)
#          gates = xproj_t + zg           (order [i, f, o | g])
#          stm   = tanh(zs + b_stm)
#          c'    = f * (c - stm + stm * dg) + i * g
#          h'    = o * tanh(c')
#   head:  sigmoid(relu(H_blk @ fcW + fcB) @ outW_pad + outB_pad)
# h, c persist in VMEM scratch across the sequential time-block grid axis.
# ----------------------------------------------------------------------------
def fused_tlstm_kernel(x_ref, wa_ref, ug_ref, us_ref, bstm_ref,
                       fcw_ref, fcb_ref, outw_ref, outb_ref,
                       o_ref, h_sc, c_sc, xproj_sc, hblk_sc):
    t_blk = pl.program_id(1)

    BB, HS = h_sc.shape
    TTB = x_ref.shape[0]            # TT * BB
    TT = TTB // BB
    F_aug = x_ref.shape[1]
    F_in = F_aug - 2                # column F_in = dg, column F_in+1 = 1.0

    # reset the recurrent carry at the start of each batch block's time loop
    @pl.when(t_blk == 0)
    def _():
        h_sc[...] = jnp.zeros_like(h_sc)
        c_sc[...] = jnp.zeros_like(c_sc)

    # Block-level input projection (embed + gate bias already folded into W_aug;
    # the dg column hits a zero row).  Optionally bf16 on the MXU.
    xproj_sc[...] = jnp.dot(x_ref[...].astype(wa_ref.dtype), wa_ref[...],
                            preferred_element_type=jnp.float32)

    # hoisted broadcast (JAX does not CSE broadcast_in_dim inside the loop)
    b_stm = jnp.broadcast_to(bstm_ref[...], (BB, HS))

    def step(t, carry):
        h, c = carry
        row0 = pl.multiple_of(t * BB, BB)
        # two independent small matmuls — no concat, no zero-padded K
        zg = jnp.dot(h, ug_ref[...], preferred_element_type=jnp.float32)   # (BB, 4HS)
        zs = jnp.dot(c, us_ref[...], preferred_element_type=jnp.float32)   # (BB, HS)
        gates = xproj_sc[pl.ds(row0, BB)] + zg
        # gate order [i, f, o | g]: one contiguous sigmoid + one tanh
        sig = jax.nn.sigmoid(gates[:, :3 * HS])
        i_t = sig[:, :HS]
        f_t = sig[:, HS:2 * HS]
        o_t = sig[:, 2 * HS:3 * HS]
        g_t = jnp.tanh(gates[:, 3 * HS:4 * HS])
        stm = jnp.tanh(zs + b_stm)
        dg_t = x_ref[pl.ds(row0, BB), pl.ds(F_in, 1)]                       # (BB, 1)
        c_new = f_t * ((c - stm) + stm * dg_t) + i_t * g_t
        h_new = o_t * jnp.tanh(c_new)
        hblk_sc[pl.ds(row0, BB), :] = h_new
        return (h_new, c_new)

    unroll = True if TT <= 16 else 8        # partial unroll once TT grows
    h_fin, c_fin = lax.fori_loop(0, TT, step, (h_sc[...], c_sc[...]),
                                 unroll=unroll)
    h_sc[...] = h_fin
    c_sc[...] = c_fin

    # Fused head over the whole block.  out weights are zero-padded to OUT_PAD
    # lanes host-side, so this store is a dense unmasked (TT*BB, OUT_PAD) slab.
    fc = jnp.maximum(
        jnp.dot(hblk_sc[...].astype(fcw_ref.dtype), fcw_ref[...],
                preferred_element_type=jnp.float32) + fcb_ref[...], 0.0)
    logits = jnp.dot(fc.astype(outw_ref.dtype), outw_ref[...],
                     preferred_element_type=jnp.float32) + outb_ref[...]
    o_ref[...] = jax.nn.sigmoid(logits)


# ----------------------------------------------------------------------------
# Wrapper
# ----------------------------------------------------------------------------
def bitlstm_forward(params, delta, batch_xs, *, time_block=32, batch_block=None,
                    use_bf16_matmul=False):
    """delta: (B, T) f32, batch_xs: (B, T, F) f32 -> (B, T, output_sz)."""
    B, T, F = batch_xs.shape
    HS = params["U_forward"].shape[0]
    FC = params["fc_w"].shape[1]
    OUT = params["out_w"].shape[1]

    BB = B if batch_block is None else min(batch_block, B)
    assert B % BB == 0, "batch_block must divide batch size"
    nB = B // BB                       # >1 only useful on v7x (2 TCs)

    TT = min(time_block, T)
    T_pad = ((T + TT - 1) // TT) * TT
    n_blk = T_pad // TT

    LANES = 128
    OUT_PAD = ((OUT + LANES - 1) // LANES) * LANES
    F_aug = F + 2
    f32 = jnp.float32
    mm_dtype = jnp.bfloat16 if use_bf16_matmul else f32

    # --- tiny host-side precompute -------------------------------------------
    # gate column reorder [i, f, g, o] -> [i, f, o, g]
    perm = np.concatenate([np.arange(0, 2 * HS), np.arange(3 * HS, 4 * HS),
                           np.arange(2 * HS, 3 * HS)])
    W_eff = (params["embed"] @ params["W_forward"])[:, perm]            # (F, 4HS)
    b_g = params["bias_forward"][:4 * HS][perm].reshape(1, 4 * HS)
    # augmented projection rows: [features | dg (zero row) | ones (gate-bias row)]
    W_aug = jnp.concatenate(
        [W_eff, jnp.zeros((1, 4 * HS), f32), b_g], axis=0).astype(mm_dtype)

    U_g = params["U_forward"][:, :4 * HS][:, perm]                      # f32 (recurrence)
    U_s = params["U_forward"][:, 4 * HS:5 * HS]
    b_stm = params["bias_forward"][4 * HS:5 * HS].reshape(1, HS)

    fc_w = params["fc_w"].astype(mm_dtype)
    fc_b = params["fc_b"].reshape(1, FC)
    out_w_pad = jnp.zeros((FC, OUT_PAD), f32).at[:, :OUT].set(
        params["out_w"]).astype(mm_dtype)
    out_b_pad = jnp.zeros((1, OUT_PAD), f32).at[:, :OUT].set(
        params["out_b"].reshape(1, OUT))

    # --- 2D time-major-flattened input layout: (nB, T_pad*BB, F+2) -----------
    dg = 1.0 / jnp.log(delta + math.e)                                  # (B, T)
    x_aug = jnp.concatenate(
        [batch_xs, dg[:, :, None], jnp.ones((B, T, 1), f32)], axis=-1)  # (B, T, F+2)
    x_aug = x_aug.reshape(nB, BB, T, F_aug).transpose(0, 2, 1, 3)       # (nB, T, BB, F+2)
    if T_pad != T:
        x_aug = jnp.concatenate(
            [x_aug, jnp.zeros((nB, T_pad - T, BB, F_aug), f32)], axis=1)
    x_aug = x_aug.reshape(nB, T_pad * BB, F_aug)

    out2d = pl.pallas_call(
        fused_tlstm_kernel,
        out_shape=jax.ShapeDtypeStruct((nB, T_pad * BB, OUT_PAD), f32),
        grid_spec=pltpu.PrefetchScalarGridSpec(
            num_scalar_prefetch=0,
            grid=(nB, n_blk),
            in_specs=[
                pl.BlockSpec((None, TT * BB, F_aug), lambda b, t: (b, t, 0)),  # x block
                pl.BlockSpec((F_aug, 4 * HS), lambda b, t: (0, 0)),   # W_aug (resident)
                pl.BlockSpec((HS, 4 * HS), lambda b, t: (0, 0)),      # U_gates (resident)
                pl.BlockSpec((HS, HS), lambda b, t: (0, 0)),          # U_stm (resident)
                pl.BlockSpec((1, HS), lambda b, t: (0, 0)),           # stm bias (resident)
                pl.BlockSpec((HS, FC), lambda b, t: (0, 0)),          # fc_w (resident)
                pl.BlockSpec((1, FC), lambda b, t: (0, 0)),           # fc_b (resident)
                pl.BlockSpec((FC, OUT_PAD), lambda b, t: (0, 0)),     # out_w padded
                pl.BlockSpec((1, OUT_PAD), lambda b, t: (0, 0)),      # out_b padded
            ],
            out_specs=pl.BlockSpec((None, TT * BB, OUT_PAD), lambda b, t: (b, t, 0)),
            scratch_shapes=[
                pltpu.VMEM((BB, HS), f32),            # h carry
                pltpu.VMEM((BB, HS), f32),            # c carry
                pltpu.VMEM((TT * BB, 4 * HS), f32),   # x-projection block
                pltpu.VMEM((TT * BB, HS), f32),       # h block (feeds fused head)
            ],
        ),
        compiler_params=pltpu.CompilerParams(
            # batch blocks are independent (v7x megacore); the time-block axis
            # carries h/c in scratch and MUST stay the inner sequential axis.
            dimension_semantics=("parallel", "arbitrary"),
        ),
    )(x_aug, W_aug, U_g, U_s, b_stm, fc_w, fc_b, out_w_pad, out_b_pad)

    out = out2d[:, :, :OUT].reshape(nB, T_pad, BB, OUT)[:, :T]          # (nB, T, BB, OUT)
    return out.transpose(0, 2, 1, 3).reshape(B, T, OUT)


# ----------------------------------------------------------------------------
# Deterministic parameter init (shapes from biTLSTM.__init__)
# ----------------------------------------------------------------------------
def init_params(key, input_sz, hidden_sz, fc_sz, output_sz, embed_sz=28):
    ks = jax.random.split(key, 8)
    gain = math.sqrt(2.0)  # calculate_gain('relu')

    def xavier(k, shape):
        fan_in, fan_out = shape[0], shape[1]
        std = gain * math.sqrt(2.0 / (fan_in + fan_out))
        return std * jax.random.normal(k, shape, dtype=jnp.float32)

    return {
        "embed": xavier(ks[0], (input_sz, embed_sz)),
        "W_forward": xavier(ks[1], (embed_sz, hidden_sz * 4)),
        "U_forward": xavier(ks[2], (hidden_sz, hidden_sz * 5)),
        "bias_forward": jax.random.normal(ks[3], (hidden_sz * 5,), dtype=jnp.float32),
        # nn.Linear params stored already transposed: (in, out)
        "fc_w": 0.1 * jax.random.normal(ks[4], (hidden_sz, fc_sz), dtype=jnp.float32),
        "fc_b": 0.1 * jax.random.normal(ks[5], (fc_sz,), dtype=jnp.float32),
        "out_w": 0.1 * jax.random.normal(ks[6], (fc_sz, output_sz), dtype=jnp.float32),
        "out_b": 0.1 * jax.random.normal(ks[7], (output_sz,), dtype=jnp.float32),
    }


# ----------------------------------------------------------------------------
# Pure-JAX reference (mirrors the PyTorch forward, non-bidir, non-survival)
# ----------------------------------------------------------------------------
def reference_forward(params, delta, batch_xs):
    B, T, _ = batch_xs.shape
    HS = params["U_forward"].shape[0]
    delta_g = 1.0 / jnp.log(delta[:, :, None] + math.e)
    v = batch_xs @ params["embed"]
    h = jnp.zeros((B, HS), jnp.float32)
    c = jnp.zeros((B, HS), jnp.float32)
    U, b = params["U_forward"], params["bias_forward"]
    hs = []
    for t in range(T):
        x_t = v[:, t, :]
        d_t = delta_g[:, t, :]
        gates = x_t @ params["W_forward"] + h @ U[:, :4 * HS] + b[:4 * HS]
        i_t = jax.nn.sigmoid(gates[:, :HS])
        f_t = jax.nn.sigmoid(gates[:, HS:2 * HS])
        g_t = jnp.tanh(gates[:, 2 * HS:3 * HS])
        o_t = jax.nn.sigmoid(gates[:, 3 * HS:])
        stm = jnp.tanh(c @ U[:, 4 * HS:5 * HS] + b[4 * HS:5 * HS])
        c = f_t * ((c - stm) + stm * d_t) + i_t * g_t
        h = o_t * jnp.tanh(c)
        hs.append(h)
    h_seq = jnp.stack(hs, axis=1)
    fc = jnp.maximum(h_seq @ params["fc_w"] + params["fc_b"], 0.0)
    return jax.nn.sigmoid(fc @ params["out_w"] + params["out_b"])


# TODO(synk): bidirectional=True and survival=True branches not implemented
# (module defaults are False); dropout is eval-mode identity.

if __name__ == "__main__":
    B, T = 16, 16
    input_sz, hidden_sz, fc_sz, output_sz, embed_sz = 16, 32, 16, 4, 28

    key = jax.random.PRNGKey(0)
    kp, kx, kd = jax.random.split(key, 3)
    params = init_params(kp, input_sz, hidden_sz, fc_sz, output_sz, embed_sz)

    batch_xs = jax.random.normal(kx, (B, T, input_sz), dtype=jnp.float32)
    delta = jax.random.uniform(kd, (B, T), dtype=jnp.float32, minval=0.0, maxval=10.0)

    # small time_block / batch_block to exercise the sequential time-carry across
    # grid blocks and the (v7x) parallel batch axis even at demo shapes.
    out = bitlstm_forward(params, delta, batch_xs, time_block=8, batch_block=8)
    out = jax.block_until_ready(out)

    ref = reference_forward(params, delta, batch_xs)
    assert out.shape == (B, T, output_sz)
    np.testing.assert_allclose(np.asarray(out), np.asarray(ref), rtol=2e-4, atol=1e-5)

    # bf16-MXU fast path (v6e/v7x); recurrence stays f32 — loose sanity check only.
    out_bf16 = bitlstm_forward(params, delta, batch_xs, time_block=8, batch_block=8,
                               use_bf16_matmul=True)
    out_bf16 = jax.block_until_ready(out_bf16)
    assert out_bf16.shape == (B, T, output_sz)
    assert bool(jnp.all(jnp.isfinite(out_bf16)))

    print("KERNEL_OK")
</pallas_src>

<mosaic_0001>
module attributes {stable_mosaic.version = 11 : i64} {
  func.func @fused_tlstm_kernel(%arg0: i32, %arg1: i32, %arg2: memref<1x64x18xf32, #tpu.memory_space<vmem>>, %arg3: memref<18x128xf32, #tpu.memory_space<vmem>>, %arg4: memref<32x128xf32, #tpu.memory_space<vmem>>, %arg5: memref<32x32xf32, #tpu.memory_space<vmem>>, %arg6: memref<1x32xf32, #tpu.memory_space<vmem>>, %arg7: memref<32x16xf32, #tpu.memory_space<vmem>>, %arg8: memref<1x16xf32, #tpu.memory_space<vmem>>, %arg9: memref<16x128xf32, #tpu.memory_space<vmem>>, %arg10: memref<1x128xf32, #tpu.memory_space<vmem>>, %arg11: memref<1x64x128xf32, #tpu.memory_space<vmem>>, %arg12: memref<8x32xf32, #tpu.memory_space<vmem>>, %arg13: memref<8x32xf32, #tpu.memory_space<vmem>>, %arg14: memref<64x128xf32, #tpu.memory_space<vmem>>, %arg15: memref<64x32xf32, #tpu.memory_space<vmem>>) attributes {dimension_semantics = [#tpu.dimension_semantics<parallel>, #tpu.dimension_semantics<arbitrary>], iteration_bounds = array<i64: 2, 2>, scalar_prefetch = 0 : i64, scratch_operands = 4 : i64, tpu.core_type = #tpu.core_type<tc>, window_params = [{transform_indices = @transform_0, window_bounds = array<i64: 1, 64, 18>}, {pipeline_mode = #tpu.pipeline_mode<synchronous>, transform_indices = @transform_1, window_bounds = array<i64: 18, 128>}, {pipeline_mode = #tpu.pipeline_mode<synchronous>, transform_indices = @transform_2, window_bounds = array<i64: 32, 128>}, {pipeline_mode = #tpu.pipeline_mode<synchronous>, transform_indices = @transform_3, window_bounds = array<i64: 32, 32>}, {pipeline_mode = #tpu.pipeline_mode<synchronous>, transform_indices = @transform_4, window_bounds = array<i64: 1, 32>}, {pipeline_mode = #tpu.pipeline_mode<synchronous>, transform_indices = @transform_5, window_bounds = array<i64: 32, 16>}, {pipeline_mode = #tpu.pipeline_mode<synchronous>, transform_indices = @transform_6, window_bounds = array<i64: 1, 16>}, {pipeline_mode = #tpu.pipeline_mode<synchronous>, transform_indices = @transform_7, window_bounds = array<i64: 16, 128>}, {pipeline_mode = #tpu.pipeline_mode<synchronous>, transform_indices = @transform_8, window_bounds = array<i64: 1, 128>}, {transform_indices = @transform_9, window_bounds = array<i64: 1, 64, 128>}]} {
    %c0_i32 = arith.constant 0 : i32
    %0 = arith.cmpi eq, %arg1, %c0_i32 : i32
    %1 = arith.extui %0 : i1 to i32
    %c0_i32_0 = arith.constant 0 : i32
    %2 = arith.cmpi ne, %1, %c0_i32_0 : i32
    scf.if %2 {
      %cst_130 = arith.constant 0.000000e+00 : f32
      %324 = vector.broadcast %cst_130 : f32 to vector<8x32xf32>
      %c0_131 = arith.constant 0 : index
      %c0_132 = arith.constant 0 : index
      %325 = vector.load %arg12[%c0_131, %c0_132] : memref<8x32xf32, #tpu.memory_space<vmem>>, vector<8x32xf32>
      tpu.vector_store %arg12[%c0_131, %c0_132], %324 {strides = array<i32>} : memref<8x32xf32, #tpu.memory_space<vmem>>, vector<8x32xf32>,
      %cst_133 = arith.constant 0.000000e+00 : f32
      %326 = vector.broadcast %cst_133 : f32 to vector<8x32xf32>
      %c0_134 = arith.constant 0 : index
      %c0_135 = arith.constant 0 : index
      %327 = vector.load %arg13[%c0_134, %c0_135] : memref<8x32xf32, #tpu.memory_space<vmem>>, vector<8x32xf32>
      tpu.vector_store %arg13[%c0_134, %c0_135], %326 {strides = array<i32>} : memref<8x32xf32, #tpu.memory_space<vmem>>, vector<8x32xf32>,
    } else {
    }
    %c0 = arith.constant 0 : index
    %c0_1 = arith.constant 0 : index
    %c0_2 = arith.constant 0 : index
    %3 = vector.load %arg2[%c0, %c0_1, %c0_2] : memref<1x64x18xf32, #tpu.memory_space<vmem>>, vector<1x64x18xf32>
    %4 = vector.shape_cast %3 : vector<1x64x18xf32> to vector<64x18xf32>
    %c0_3 = arith.constant 0 : index
    %c0_4 = arith.constant 0 : index
    %5 = vector.load %arg3[%c0_3, %c0_4] : memref<18x128xf32, #tpu.memory_space<vmem>>, vector<18x128xf32>
    %cst = arith.constant dense<0.000000e+00> : vector<64x128xf32>
    %6 = tpu.matmul %4, %5, %cst {dimension_numbers = #tpu.dot_dimension_numbers<[1], [0], [0], [1], [0, 0, 1, 1], [], []>} : vector<64x18xf32>, vector<18x128xf32>, vector<64x128xf32> -> vector<64x128xf32>
    %c0_5 = arith.constant 0 : index
    %c0_6 = arith.constant 0 : index
    %7 = vector.load %arg14[%c0_5, %c0_6] : memref<64x128xf32, #tpu.memory_space<vmem>>, vector<64x128xf32>
    tpu.vector_store %arg14[%c0_5, %c0_6], %6 {strides = array<i32>} : memref<64x128xf32, #tpu.memory_space<vmem>>, vector<64x128xf32>,
    %c0_7 = arith.constant 0 : index
    %c0_8 = arith.constant 0 : index
    %8 = vector.load %arg6[%c0_7, %c0_8] : memref<1x32xf32, #tpu.memory_space<vmem>>, vector<1x32xf32>
    %9 = vector.shape_cast %8 : vector<1x32xf32> to vector<1x32xf32>
    %10 = vector.broadcast %9 : vector<1x32xf32> to vector<8x32xf32>
    %c0_9 = arith.constant 0 : index
    %c0_10 = arith.constant 0 : index
    %11 = vector.load %arg12[%c0_9, %c0_10] : memref<8x32xf32, #tpu.memory_space<vmem>>, vector<8x32xf32>
    %c0_11 = arith.constant 0 : index
    %c0_12 = arith.constant 0 : index
    %12 = vector.load %arg13[%c0_11, %c0_12] : memref<8x32xf32, #tpu.memory_space<vmem>>, vector<8x32xf32>
    %c0_i32_13 = arith.constant 0 : i32
    %c8_i32 = arith.constant 8 : i32
    %13 = arith.muli %c0_i32_13, %c8_i32 : i32
    %14 = tpu.assume_multiple %13, 8 : i32
    %c0_14 = arith.constant 0 : index
    %c0_15 = arith.constant 0 : index
    %15 = vector.load %arg4[%c0_14, %c0_15] : memref<32x128xf32, #tpu.memory_space<vmem>>, vector<32x128xf32>
    %cst_16 = arith.constant dense<0.000000e+00> : vector<8x128xf32>
    %16 = tpu.matmul %11, %15, %cst_16 {dimension_numbers = #tpu.dot_dimension_numbers<[1], [0], [0], [1], [0, 0, 1, 1], [], []>} : vector<8x32xf32>, vector<32x128xf32>, vector<8x128xf32> -> vector<8x128xf32>
    %c0_17 = arith.constant 0 : index
    %c0_18 = arith.constant 0 : index
    %17 = vector.load %arg5[%c0_17, %c0_18] : memref<32x32xf32, #tpu.memory_space<vmem>>, vector<32x32xf32>
    %cst_19 = arith.constant dense<0.000000e+00> : vector<8x32xf32>
    %18 = tpu.matmul %12, %17, %cst_19 {dimension_numbers = #tpu.dot_dimension_numbers<[1], [0], [0], [1], [0, 0, 1, 1], [], []>} : vector<8x32xf32>, vector<32x32xf32>, vector<8x32xf32> -> vector<8x32xf32>
    %19 = arith.index_cast %14 : i32 to index
    %c0_20 = arith.constant 0 : index
    %20 = vector.load %arg14[%19, %c0_20] : memref<64x128xf32, #tpu.memory_space<vmem>>, vector<8x128xf32>
    %21 = arith.addf %20, %16 : vector<8x128xf32>
    %22 = vector.extract_strided_slice %21 {offsets = [0, 0], sizes = [8, 96], strides = [1, 1]} : vector<8x128xf32> to vector<8x96xf32>
    %23 = arith.negf %22 : vector<8x96xf32>
    %24 = math.exp %23 : vector<8x96xf32>
    %cst_21 = arith.constant 1.000000e+00 : f32
    %25 = vector.broadcast %cst_21 : f32 to vector<8x96xf32>
    %26 = arith.addf %25, %24 : vector<8x96xf32>
    %27 = arith.divf %25, %26 : vector<8x96xf32>
    %28 = vector.extract_strided_slice %27 {offsets = [0, 0], sizes = [8, 32], strides = [1, 1]} : vector<8x96xf32> to vector<8x32xf32>
    %29 = vector.extract_strided_slice %27 {offsets = [0, 32], sizes = [8, 32], strides = [1, 1]} : vector<8x96xf32> to vector<8x32xf32>
    %30 = vector.extract_strided_slice %27 {offsets = [0, 64], sizes = [8, 32], strides = [1, 1]} : vector<8x96xf32> to vector<8x32xf32>
    %31 = vector.extract_strided_slice %21 {offsets = [0, 96], sizes = [8, 32], strides = [1, 1]} : vector<8x128xf32> to vector<8x32xf32>
    %32 = math.tanh %31 : vector<8x32xf32>
    %33 = arith.addf %18, %10 : vector<8x32xf32>
    %34 = math.tanh %33 : vector<8x32xf32>
    %c0_22 = arith.constant 0 : index
    %35 = arith.index_cast %14 : i32 to index
    %c16 = arith.constant 16 : index
    %36 = vector.load %arg2[%c0_22, %35, %c16] : memref<1x64x18xf32, #tpu.memory_space<vmem>>, vector<1x8x1xf32>
    %37 = vector.shape_cast %36 : vector<1x8x1xf32> to vector<8x1xf32>
    %38 = arith.subf %12, %34 : vector<8x32xf32>
    %39 = vector.broadcast %37 : vector<8x1xf32> to vector<8x32xf32>
    %40 = arith.mulf %34, %39 : vector<8x32xf32>
    %41 = arith.addf %38, %40 : vector<8x32xf32>
    %42 = arith.mulf %29, %41 : vector<8x32xf32>
    %43 = arith.mulf %28, %32 : vector<8x32xf32>
    %44 = arith.addf %42, %43 : vector<8x32xf32>
    %45 = math.tanh %44 : vector<8x32xf32>
    %46 = arith.mulf %30, %45 : vector<8x32xf32>
    %47 = arith.index_cast %14 : i32 to index
    %c0_23 = arith.constant 0 : index
    %48 = vector.load %arg15[%47, %c0_23] : memref<64x32xf32, #tpu.memory_space<vmem>>, vector<8x32xf32>
    tpu.vector_store %arg15[%47, %c0_23], %46 {strides = array<i32>} : memref<64x32xf32, #tpu.memory_space<vmem>>, vector<8x32xf32>,
    %c1_i32 = arith.constant 1 : i32
    %c8_i32_24 = arith.constant 8 : i32
    %49 = arith.muli %c1_i32, %c8_i32_24 : i32
    %50 = tpu.assume_multiple %49, 8 : i32
    %c0_25 = arith.constant 0 : index
    %c0_26 = arith.constant 0 : index
    %51 = vector.load %arg4[%c0_25, %c0_26] : memref<32x128xf32, #tpu.memory_space<vmem>>, vector<32x128xf32>
    %cst_27 = arith.constant dense<0.000000e+00> : vector<8x128xf32>
    %52 = tpu.matmul %46, %51, %cst_27 {dimension_numbers = #tpu.dot_dimension_numbers<[1], [0], [0], [1], [0, 0, 1, 1], [], []>} : vector<8x32xf32>, vector<32x128xf32>, vector<8x128xf32> -> vector<8x128xf32>
    %c0_28 = arith.constant 0 : index
    %c0_29 = arith.constant 0 : index
    %53 = vector.load %arg5[%c0_28, %c0_29] : memref<32x32xf32, #tpu.memory_space<vmem>>, vector<32x32xf32>
    %cst_30 = arith.constant dense<0.000000e+00> : vector<8x32xf32>
    %54 = tpu.matmul %44, %53, %cst_30 {dimension_numbers = #tpu.dot_dimension_numbers<[1], [0], [0], [1], [0, 0, 1, 1], [], []>} : vector<8x32xf32>, vector<32x32xf32>, vector<8x32xf32> -> vector<8x32xf32>
    %55 = arith.index_cast %50 : i32 to index
    %c0_31 = arith.constant 0 : index
    %56 = vector.load %arg14[%55, %c0_31] : memref<64x128xf32, #tpu.memory_space<vmem>>, vector<8x128xf32>
    %57 = arith.addf %56, %52 : vector<8x128xf32>
    %58 = vector.extract_strided_slice %57 {offsets = [0, 0], sizes = [8, 96], strides = [1, 1]} : vector<8x128xf32> to vector<8x96xf32>
    %59 = arith.negf %58 : vector<8x96xf32>
    %60 = math.exp %59 : vector<8x96xf32>
    %cst_32 = arith.constant 1.000000e+00 : f32
    %61 = vector.broadcast %cst_32 : f32 to vector<8x96xf32>
    %62 = arith.addf %61, %60 : vector<8x96xf32>
    %63 = arith.divf %61, %62 : vector<8x96xf32>
    %64 = vector.extract_strided_slice %63 {offsets = [0, 0], sizes = [8, 32], strides = [1, 1]} : vector<8x96xf32> to vector<8x32xf32>
    %65 = vector.extract_strided_slice %63 {offsets = [0, 32], sizes = [8, 32], strides = [1, 1]} : vector<8x96xf32> to vector<8x32xf32>
    %66 = vector.extract_strided_slice %63 {offsets = [0, 64], sizes = [8, 32], strides = [1, 1]} : vector<8x96xf32> to vector<8x32xf32>
    %67 = vector.extract_strided_slice %57 {offsets = [0, 96], sizes = [8, 32], strides = [1, 1]} : vector<8x128xf32> to vector<8x32xf32>
    %68 = math.tanh %67 : vector<8x32xf32>
    %69 = arith.addf %54, %10 : vector<8x32xf32>
    %70 = math.tanh %69 : vector<8x32xf32>
    %c0_33 = arith.constant 0 : index
    %71 = arith.index_cast %50 : i32 to index
    %c16_34 = arith.constant 16 : index
    %72 = vector.load %arg2[%c0_33, %71, %c16_34] : memref<1x64x18xf32, #tpu.memory_space<vmem>>, vector<1x8x1xf32>
    %73 = vector.shape_cast %72 : vector<1x8x1xf32> to vector<8x1xf32>
    %74 = arith.subf %44, %70 : vector<8x32xf32>
    %75 = vector.broadcast %73 : vector<8x1xf32> to vector<8x32xf32>
    %76 = arith.mulf %70, %75 : vector<8x32xf32>
    %77 = arith.addf %74, %76 : vector<8x32xf32>
    %78 = arith.mulf %65, %77 : vector<8x32xf32>
    %79 = arith.mulf %64, %68 : vector<8x32xf32>
    %80 = arith.addf %78, %79 : vector<8x32xf32>
    %81 = math.tanh %80 : vector<8x32xf32>
    %82 = arith.mulf %66, %81 : vector<8x32xf32>
    %83 = arith.index_cast %50 : i32 to index
    %c0_35 = arith.constant 0 : index
    %84 = vector.load %arg15[%83, %c0_35] : memref<64x32xf32, #tpu.memory_space<vmem>>, vector<8x32xf32>
    tpu.vector_store %arg15[%83, %c0_35], %82 {strides = array<i32>} : memref<64x32xf32, #tpu.memory_space<vmem>>, vector<8x32xf32>,
    %c2_i32 = arith.constant 2 : i32
    %c8_i32_36 = arith.constant 8 : i32
    %85 = arith.muli %c2_i32, %c8_i32_36 : i32
    %86 = tpu.assume_multiple %85, 8 : i32
    %c0_37 = arith.constant 0 : index
    %c0_38 = arith.constant 0 : index
    %87 = vector.load %arg4[%c0_37, %c0_38] : memref<32x128xf32, #tpu.memory_space<vmem>>, vector<32x128xf32>
    %cst_39 = arith.constant dense<0.000000e+00> : vector<8x128xf32>
    %88 = tpu.matmul %82, %87, %cst_39 {dimension_numbers = #tpu.dot_dimension_numbers<[1], [0], [0], [1], [0, 0, 1, 1], [], []>} : vector<8x32xf32>, vector<32x128xf32>, vector<8x128xf32> -> vector<8x128xf32>
    %c0_40 = arith.constant 0 : index
    %c0_41 = arith.constant 0 : index
    %89 = vector.load %arg5[%c0_40, %c0_41] : memref<32x32xf32, #tpu.memory_space<vmem>>, vector<32x32xf32>
    %cst_42 = arith.constant dense<0.000000e+00> : vector<8x32xf32>
    %90 = tpu.matmul %80, %89, %cst_42 {dimension_numbers = #tpu.dot_dimension_numbers<[1], [0], [0], [1], [0, 0, 1, 1], [], []>} : vector<8x32xf32>, vector<32x32xf32>, vector<8x32xf32> -> vector<8x32xf32>
    %91 = arith.index_cast %86 : i32 to index
    %c0_43 = arith.constant 0 : index
    %92 = vector.load %arg14[%91, %c0_43] : memref<64x128xf32, #tpu.memory_space<vmem>>, vector<8x128xf32>
    %93 = arith.addf %92, %88 : vector<8x128xf32>
    %94 = vector.extract_strided_slice %93 {offsets = [0, 0], sizes = [8, 96], strides = [1, 1]} : vector<8x128xf32> to vector<8x96xf32>
    %95 = arith.negf %94 : vector<8x96xf32>
    %96 = math.exp %95 : vector<8x96xf32>
    %cst_44 = arith.constant 1.000000e+00 : f32
    %97 = vector.broadcast %cst_44 : f32 to vector<8x96xf32>
    %98 = arith.addf %97, %96 : vector<8x96xf32>
    %99 = arith.divf %97, %98 : vector<8x96xf32>
    %100 = vector.extract_strided_slice %99 {offsets = [0, 0], sizes = [8, 32], strides = [1, 1]} : vector<8x96xf32> to vector<8x32xf32>
    %101 = vector.extract_strided_slice %99 {offsets = [0, 32], sizes = [8, 32], strides = [1, 1]} : vector<8x96xf32> to vector<8x32xf32>
    %102 = vector.extract_strided_slice %99 {offsets = [0, 64], sizes = [8, 32], strides = [1, 1]} : vector<8x96xf32> to vector<8x32xf32>
    %103 = vector.extract_strided_slice %93 {offsets = [0, 96], sizes = [8, 32], strides = [1, 1]} : vector<8x128xf32> to vector<8x32xf32>
    %104 = math.tanh %103 : vector<8x32xf32>
    %105 = arith.addf %90, %10 : vector<8x32xf32>
    %106 = math.tanh %105 : vector<8x32xf32>
    %c0_45 = arith.constant 0 : index
    %107 = arith.index_cast %86 : i32 to index
    %c16_46 = arith.constant 16 : index
    %108 = vector.load %arg2[%c0_45, %107, %c16_46] : memref<1x64x18xf32, #tpu.memory_space<vmem>>, vector<1x8x1xf32>
    %109 = vector.shape_cast %108 : vector<1x8x1xf32> to vector<8x1xf32>
    %110 = arith.subf %80, %106 : vector<8x32xf32>
    %111 = vector.broadcast %109 : vector<8x1xf32> to vector<8x32xf32>
    %112 = arith.mulf %106, %111 : vector<8x32xf32>
    %113 = arith.addf %110, %112 : vector<8x32xf32>
    %114 = arith.mulf %101, %113 : vector<8x32xf32>
    %115 = arith.mulf %100, %104 : vector<8x32xf32>
    %116 = arith.addf %114, %115 : vector<8x32xf32>
    %117 = math.tanh %116 : vector<8x32xf32>
    %118 = arith.mulf %102, %117 : vector<8x32xf32>
    %119 = arith.index_cast %86 : i32 to index
    %c0_47 = arith.constant 0 : index
    %120 = vector.load %arg15[%119, %c0_47] : memref<64x32xf32, #tpu.memory_space<vmem>>, vector<8x32xf32>
    tpu.vector_store %arg15[%119, %c0_47], %118 {strides = array<i32>} : memref<64x32xf32, #tpu.memory_space<vmem>>, vector<8x32xf32>,
    %c3_i32 = arith.constant 3 : i32
    %c8_i32_48 = arith.constant 8 : i32
    %121 = arith.muli %c3_i32, %c8_i32_48 : i32
    %122 = tpu.assume_multiple %121, 8 : i32
    %c0_49 = arith.constant 0 : index
    %c0_50 = arith.constant 0 : index
    %123 = vector.load %arg4[%c0_49, %c0_50] : memref<32x128xf32, #tpu.memory_space<vmem>>, vector<32x128xf32>
    %cst_51 = arith.constant dense<0.000000e+00> : vector<8x128xf32>
    %124 = tpu.matmul %118, %123, %cst_51 {dimension_numbers = #tpu.dot_dimension_numbers<[1], [0], [0], [1], [0, 0, 1, 1], [], []>} : vector<8x32xf32>, vector<32x128xf32>, vector<8x128xf32> -> vector<8x128xf32>
    %c0_52 = arith.constant 0 : index
    %c0_53 = arith.constant 0 : index
    %125 = vector.load %arg5[%c0_52, %c0_53] : memref<32x32xf32, #tpu.memory_space<vmem>>, vector<32x32xf32>
    %cst_54 = arith.constant dense<0.000000e+00> : vector<8x32xf32>
    %126 = tpu.matmul %116, %125, %cst_54 {dimension_numbers = #tpu.dot_dimension_numbers<[1], [0], [0], [1], [0, 0, 1, 1], [], []>} : vector<8x32xf32>, vector<32x32xf32>, vector<8x32xf32> -> vector<8x32xf32>
    %127 = arith.index_cast %122 : i32 to index
    %c0_55 = arith.constant 0 : index
    %128 = vector.load %arg14[%127, %c0_55] : memref<64x128xf32, #tpu.memory_space<vmem>>, vector<8x128xf32>
    %129 = arith.addf %128, %124 : vector<8x128xf32>
    %130 = vector.extract_strided_slice %129 {offsets = [0, 0], sizes = [8, 96], strides = [1, 1]} : vector<8x128xf32> to vector<8x96xf32>
    %131 = arith.negf %130 : vector<8x96xf32>
    %132 = math.exp %131 : vector<8x96xf32>
    %cst_56 = arith.constant 1.000000e+00 : f32
    %133 = vector.broadcast %cst_56 : f32 to vector<8x96xf32>
    %134 = arith.addf %133, %132 : vector<8x96xf32>
    %135 = arith.divf %133, %134 : vector<8x96xf32>
    %136 = vector.extract_strided_slice %135 {offsets = [0, 0], sizes = [8, 32], strides = [1, 1]} : vector<8x96xf32> to vector<8x32xf32>
    %137 = vector.extract_strided_slice %135 {offsets = [0, 32], sizes = [8, 32], strides = [1, 1]} : vector<8x96xf32> to vector<8x32xf32>
    %138 = vector.extract_strided_slice %135 {offsets = [0, 64], sizes = [8, 32], strides = [1, 1]} : vector<8x96xf32> to vector<8x32xf32>
    %139 = vector.extract_strided_slice %129 {offsets = [0, 96], sizes = [8, 32], strides = [1, 1]} : vector<8x128xf32> to vector<8x32xf32>
    %140 = math.tanh %139 : vector<8x32xf32>
    %141 = arith.addf %126, %10 : vector<8x32xf32>
    %142 = math.tanh %141 : vector<8x32xf32>
    %c0_57 = arith.constant 0 : index
    %143 = arith.index_cast %122 : i32 to index
    %c16_58 = arith.constant 16 : index
    %144 = vector.load %arg2[%c0_57, %143, %c16_58] : memref<1x64x18xf32, #tpu.memory_space<vmem>>, vector<1x8x1xf32>
    %145 = vector.shape_cast %144 : vector<1x8x1xf32> to vector<8x1xf32>
    %146 = arith.subf %116, %142 : vector<8x32xf32>
    %147 = vector.broadcast %145 : vector<8x1xf32> to vector<8x32xf32>
    %148 = arith.mulf %142, %147 : vector<8x32xf32>
    %149 = arith.addf %146, %148 : vector<8x32xf32>
    %150 = arith.mulf %137, %149 : vector<8x32xf32>
    %151 = arith.mulf %136, %140 : vector<8x32xf32>
    %152 = arith.addf %150, %151 : vector<8x32xf32>
    %153 = math.tanh %152 : vector<8x32xf32>
    %154 = arith.mulf %138, %153 : vector<8x32xf32>
    %155 = arith.index_cast %122 : i32 to index
    %c0_59 = arith.constant 0 : index
    %156 = vector.load %arg15[%155, %c0_59] : memref<64x32xf32, #tpu.memory_space<vmem>>, vector<8x32xf32>
    tpu.vector_store %arg15[%155, %c0_59], %154 {strides = array<i32>} : memref<64x32xf32, #tpu.memory_space<vmem>>, vector<8x32xf32>,
    %c4_i32 = arith.constant 4 : i32
    %c8_i32_60 = arith.constant 8 : i32
    %157 = arith.muli %c4_i32, %c8_i32_60 : i32
    %158 = tpu.assume_multiple %157, 8 : i32
    %c0_61 = arith.constant 0 : index
    %c0_62 = arith.constant 0 : index
    %159 = vector.load %arg4[%c0_61, %c0_62] : memref<32x128xf32, #tpu.memory_space<vmem>>, vector<32x128xf32>
    %cst_63 = arith.constant dense<0.000000e+00> : vector<8x128xf32>
    %160 = tpu.matmul %154, %159, %cst_63 {dimension_numbers = #tpu.dot_dimension_numbers<[1], [0], [0], [1], [0, 0, 1, 1], [], []>} : vector<8x32xf32>, vector<32x128xf32>, vector<8x128xf32> -> vector<8x128xf32>
    %c0_64 = arith.constant 0 : index
    %c0_65 = arith.constant 0 : index
    %161 = vector.load %arg5[%c0_64, %c0_65] : memref<32x32xf32, #tpu.memory_space<vmem>>, vector<32x32xf32>
    %cst_66 = arith.constant dense<0.000000e+00> : vector<8x32xf32>
    %162 = tpu.matmul %152, %161, %cst_66 {dimension_numbers = #tpu.dot_dimension_numbers<[1], [0], [0], [1], [0, 0, 1, 1], [], []>} : vector<8x32xf32>, vector<32x32xf32>, vector<8x32xf32> -> vector<8x32xf32>
    %163 = arith.index_cast %158 : i32 to index
    %c0_67 = arith.constant 0 : index
    %164 = vector.load %arg14[%163, %c0_67] : memref<64x128xf32, #tpu.memory_space<vmem>>, vector<8x128xf32>
    %165 = arith.addf %164, %160 : vector<8x128xf32>
    %166 = vector.extract_strided_slice %165 {offsets = [0, 0], sizes = [8, 96], strides = [1, 1]} : vector<8x128xf32> to vector<8x96xf32>
    %167 = arith.negf %166 : vector<8x96xf32>
    %168 = math.exp %167 : vector<8x96xf32>
    %cst_68 = arith.constant 1.000000e+00 : f32
    %169 = vector.broadcast %cst_68 : f32 to vector<8x96xf32>
    %170 = arith.addf %169, %168 : vector<8x96xf32>
    %171 = arith.divf %169, %170 : vector<8x96xf32>
    %172 = vector.extract_strided_slice %171 {offsets = [0, 0], sizes = [8, 32], strides = [1, 1]} : vector<8x96xf32> to vector<8x32xf32>
    %173 = vector.extract_strided_slice %171 {offsets = [0, 32], sizes = [8, 32], strides = [1, 1]} : vector<8x96xf32> to vector<8x32xf32>
    %174 = vector.extract_strided_slice %171 {offsets = [0, 64], sizes = [8, 32], strides = [1, 1]} : vector<8x96xf32> to vector<8x32xf32>
    %175 = vector.extract_strided_slice %165 {offsets = [0, 96], sizes = [8, 32], strides = [1, 1]} : vector<8x128xf32> to vector<8x32xf32>
    %176 = math.tanh %175 : vector<8x32xf32>
    %177 = arith.addf %162, %10 : vector<8x32xf32>
    %178 = math.tanh %177 : vector<8x32xf32>
    %c0_69 = arith.constant 0 : index
    %179 = arith.index_cast %158 : i32 to index
    %c16_70 = arith.constant 16 : index
    %180 = vector.load %arg2[%c0_69, %179, %c16_70] : memref<1x64x18xf32, #tpu.memory_space<vmem>>, vector<1x8x1xf32>
    %181 = vector.shape_cast %180 : vector<1x8x1xf32> to vector<8x1xf32>
    %182 = arith.subf %152, %178 : vector<8x32xf32>
    %183 = vector.broadcast %181 : vector<8x1xf32> to vector<8x32xf32>
    %184 = arith.mulf %178, %183 : vector<8x32xf32>
    %185 = arith.addf %182, %184 : vector<8x32xf32>
    %186 = arith.mulf %173, %185 : vector<8x32xf32>
    %187 = arith.mulf %172, %176 : vector<8x32xf32>
    %188 = arith.addf %186, %187 : vector<8x32xf32>
    %189 = math.tanh %188 : vector<8x32xf32>
    %190 = arith.mulf %174, %189 : vector<8x32xf32>
    %191 = arith.index_cast %158 : i32 to index
    %c0_71 = arith.constant 0 : index
    %192 = vector.load %arg15[%191, %c0_71] : memref<64x32xf32, #tpu.memory_space<vmem>>, vector<8x32xf32>
    tpu.vector_store %arg15[%191, %c0_71], %190 {strides = array<i32>} : memref<64x32xf32, #tpu.memory_space<vmem>>, vector<8x32xf32>,
    %c5_i32 = arith.constant 5 : i32
    %c8_i32_72 = arith.constant 8 : i32
    %193 = arith.muli %c5_i32, %c8_i32_72 : i32
    %194 = tpu.assume_multiple %193, 8 : i32
    %c0_73 = arith.constant 0 : index
    %c0_74 = arith.constant 0 : index
    %195 = vector.load %arg4[%c0_73, %c0_74] : memref<32x128xf32, #tpu.memory_space<vmem>>, vector<32x128xf32>
    %cst_75 = arith.constant dense<0.000000e+00> : vector<8x128xf32>
    %196 = tpu.matmul %190, %195, %cst_75 {dimension_numbers = #tpu.dot_dimension_numbers<[1], [0], [0], [1], [0, 0, 1, 1], [], []>} : vector<8x32xf32>, vector<32x128xf32>, vector<8x128xf32> -> vector<8x128xf32>
    %c0_76 = arith.constant 0 : index
    %c0_77 = arith.constant 0 : index
    %197 = vector.load %arg5[%c0_76, %c0_77] : memref<32x32xf32, #tpu.memory_space<vmem>>, vector<32x32xf32>
    %cst_78 = arith.constant dense<0.000000e+00> : vector<8x32xf32>
    %198 = tpu.matmul %188, %197, %cst_78 {dimension_numbers = #tpu.dot_dimension_numbers<[1], [0], [0], [1], [0, 0, 1, 1], [], []>} : vector<8x32xf32>, vector<32x32xf32>, vector<8x32xf32> -> vector<8x32xf32>
    %199 = arith.index_cast %194 : i32 to index
    %c0_79 = arith.constant 0 : index
    %200 = vector.load %arg14[%199, %c0_79] : memref<64x128xf32, #tpu.memory_space<vmem>>, vector<8x128xf32>
    %201 = arith.addf %200, %196 : vector<8x128xf32>
    %202 = vector.extract_strided_slice %201 {offsets = [0, 0], sizes = [8, 96], strides = [1, 1]} : vector<8x128xf32> to vector<8x96xf32>
    %203 = arith.negf %202 : vector<8x96xf32>
    %204 = math.exp %203 : vector<8x96xf32>
    %cst_80 = arith.constant 1.000000e+00 : f32
    %205 = vector.broadcast %cst_80 : f32 to vector<8x96xf32>
    %206 = arith.addf %205, %204 : vector<8x96xf32>
    %207 = arith.divf %205, %206 : vector<8x96xf32>
    %208 = vector.extract_strided_slice %207 {offsets = [0, 0], sizes = [8, 32], strides = [1, 1]} : vector<8x96xf32> to vector<8x32xf32>
    %209 = vector.extract_strided_slice %207 {offsets = [0, 32], sizes = [8, 32], strides = [1, 1]} : vector<8x96xf32> to vector<8x32xf32>
    %210 = vector.extract_strided_slice %207 {offsets = [0, 64], sizes = [8, 32], strides = [1, 1]} : vector<8x96xf32> to vector<8x32xf32>
    %211 = vector.extract_strided_slice %201 {offsets = [0, 96], sizes = [8, 32], strides = [1, 1]} : vector<8x128xf32> to vector<8x32xf32>
    %212 = math.tanh %211 : vector<8x32xf32>
    %213 = arith.addf %198, %10 : vector<8x32xf32>
    %214 = math.tanh %213 : vector<8x32xf32>
    %c0_81 = arith.constant 0 : index
    %215 = arith.index_cast %194 : i32 to index
    %c16_82 = arith.constant 16 : index
    %216 = vector.load %arg2[%c0_81, %215, %c16_82] : memref<1x64x18xf32, #tpu.memory_space<vmem>>, vector<1x8x1xf32>
    %217 = vector.shape_cast %216 : vector<1x8x1xf32> to vector<8x1xf32>
    %218 = arith.subf %188, %214 : vector<8x32xf32>
    %219 = vector.broadcast %217 : vector<8x1xf32> to vector<8x32xf32>
    %220 = arith.mulf %214, %219 : vector<8x32xf32>
    %221 = arith.addf %218, %220 : vector<8x32xf32>
    %222 = arith.mulf %209, %221 : vector<8x32xf32>
    %223 = arith.mulf %208, %212 : vector<8x32xf32>
    %224 = arith.addf %222, %223 : vector<8x32xf32>
    %225 = math.tanh %224 : vector<8x32xf32>
    %226 = arith.mulf %210, %225 : vector<8x32xf32>
    %227 = arith.index_cast %194 : i32 to index
    %c0_83 = arith.constant 0 : index
    %228 = vector.load %arg15[%227, %c0_83] : memref<64x32xf32, #tpu.memory_space<vmem>>, vector<8x32xf32>
    tpu.vector_store %arg15[%227, %c0_83], %226 {strides = array<i32>} : memref<64x32xf32, #tpu.memory_space<vmem>>, vector<8x32xf32>,
    %c6_i32 = arith.constant 6 : i32
    %c8_i32_84 = arith.constant 8 : i32
    %229 = arith.muli %c6_i32, %c8_i32_84 : i32
    %230 = tpu.assume_multiple %229, 8 : i32
    %c0_85 = arith.constant 0 : index
    %c0_86 = arith.constant 0 : index
    %231 = vector.load %arg4[%c0_85, %c0_86] : memref<32x128xf32, #tpu.memory_space<vmem>>, vector<32x128xf32>
    %cst_87 = arith.constant dense<0.000000e+00> : vector<8x128xf32>
    %232 = tpu.matmul %226, %231, %cst_87 {dimension_numbers = #tpu.dot_dimension_numbers<[1], [0], [0], [1], [0, 0, 1, 1], [], []>} : vector<8x32xf32>, vector<32x128xf32>, vector<8x128xf32> -> vector<8x128xf32>
    %c0_88 = arith.constant 0 : index
    %c0_89 = arith.constant 0 : index
    %233 = vector.load %arg5[%c0_88, %c0_89] : memref<32x32xf32, #tpu.memory_space<vmem>>, vector<32x32xf32>
    %cst_90 = arith.constant dense<0.000000e+00> : vector<8x32xf32>
    %234 = tpu.matmul %224, %233, %cst_90 {dimension_numbers = #tpu.dot_dimension_numbers<[1], [0], [0], [1], [0, 0, 1, 1], [], []>} : vector<8x32xf32>, vector<32x32xf32>, vector<8x32xf32> -> vector<8x32xf32>
    %235 = arith.index_cast %230 : i32 to index
    %c0_91 = arith.constant 0 : index
    %236 = vector.load %arg14[%235, %c0_91] : memref<64x128xf32, #tpu.memory_space<vmem>>, vector<8x128xf32>
    %237 = arith.addf %236, %232 : vector<8x128xf32>
    %238 = vector.extract_strided_slice %237 {offsets = [0, 0], sizes = [8, 96], strides = [1, 1]} : vector<8x128xf32> to vector<8x96xf32>
    %239 = arith.negf %238 : vector<8x96xf32>
    %240 = math.exp %239 : vector<8x96xf32>
    %cst_92 = arith.constant 1.000000e+00 : f32
    %241 = vector.broadcast %cst_92 : f32 to vector<8x96xf32>
    %242 = arith.addf %241, %240 : vector<8x96xf32>
    %243 = arith.divf %241, %242 : vector<8x96xf32>
    %244 = vector.extract_strided_slice %243 {offsets = [0, 0], sizes = [8, 32], strides = [1, 1]} : vector<8x96xf32> to vector<8x32xf32>
    %245 = vector.extract_strided_slice %243 {offsets = [0, 32], sizes = [8, 32], strides = [1, 1]} : vector<8x96xf32> to vector<8x32xf32>
    %246 = vector.extract_strided_slice %243 {offsets = [0, 64], sizes = [8, 32], strides = [1, 1]} : vector<8x96xf32> to vector<8x32xf32>
    %247 = vector.extract_strided_slice %237 {offsets = [0, 96], sizes = [8, 32], strides = [1, 1]} : vector<8x128xf32> to vector<8x32xf32>
    %248 = math.tanh %247 : vector<8x32xf32>
    %249 = arith.addf %234, %10 : vector<8x32xf32>
    %250 = math.tanh %249 : vector<8x32xf32>
    %c0_93 = arith.constant 0 : index
    %251 = arith.index_cast %230 : i32 to index
    %c16_94 = arith.constant 16 : index
    %252 = vector.load %arg2[%c0_93, %251, %c16_94] : memref<1x64x18xf32, #tpu.memory_space<vmem>>, vector<1x8x1xf32>
    %253 = vector.shape_cast %252 : vector<1x8x1xf32> to vector<8x1xf32>
    %254 = arith.subf %224, %250 : vector<8x32xf32>
    %255 = vector.broadcast %253 : vector<8x1xf32> to vector<8x32xf32>
    %256 = arith.mulf %250, %255 : vector<8x32xf32>
    %257 = arith.addf %254, %256 : vector<8x32xf32>
    %258 = arith.mulf %245, %257 : vector<8x32xf32>
    %259 = arith.mulf %244, %248 : vector<8x32xf32>
    %260 = arith.addf %258, %259 : vector<8x32xf32>
    %261 = math.tanh %260 : vector<8x32xf32>
    %262 = arith.mulf %246, %261 : vector<8x32xf32>
    %263 = arith.index_cast %230 : i32 to index
    %c0_95 = arith.constant 0 : index
    %264 = vector.load %arg15[%263, %c0_95] : memref<64x32xf32, #tpu.memory_space<vmem>>, vector<8x32xf32>
    tpu.vector_store %arg15[%263, %c0_95], %262 {strides = array<i32>} : memref<64x32xf32, #tpu.memory_space<vmem>>, vector<8x32xf32>,
    %c7_i32 = arith.constant 7 : i32
    %c8_i32_96 = arith.constant 8 : i32
    %265 = arith.muli %c7_i32, %c8_i32_96 : i32
    %266 = tpu.assume_multiple %265, 8 : i32
    %c0_97 = arith.constant 0 : index
    %c0_98 = arith.constant 0 : index
    %267 = vector.load %arg4[%c0_97, %c0_98] : memref<32x128xf32, #tpu.memory_space<vmem>>, vector<32x128xf32>
    %cst_99 = arith.constant dense<0.000000e+00> : vector<8x128xf32>
    %268 = tpu.matmul %262, %267, %cst_99 {dimension_numbers = #tpu.dot_dimension_numbers<[1], [0], [0], [1], [0, 0, 1, 1], [], []>} : vector<8x32xf32>, vector<32x128xf32>, vector<8x128xf32> -> vector<8x128xf32>
    %c0_100 = arith.constant 0 : index
    %c0_101 = arith.constant 0 : index
    %269 = vector.load %arg5[%c0_100, %c0_101] : memref<32x32xf32, #tpu.memory_space<vmem>>, vector<32x32xf32>
    %cst_102 = arith.constant dense<0.000000e+00> : vector<8x32xf32>
    %270 = tpu.matmul %260, %269, %cst_102 {dimension_numbers = #tpu.dot_dimension_numbers<[1], [0], [0], [1], [0, 0, 1, 1], [], []>} : vector<8x32xf32>, vector<32x32xf32>, vector<8x32xf32> -> vector<8x32xf32>
    %271 = arith.index_cast %266 : i32 to index
    %c0_103 = arith.constant 0 : index
    %272 = vector.load %arg14[%271, %c0_103] : memref<64x128xf32, #tpu.memory_space<vmem>>, vector<8x128xf32>
    %273 = arith.addf %272, %268 : vector<8x128xf32>
    %274 = vector.extract_strided_slice %273 {offsets = [0, 0], sizes = [8, 96], strides = [1, 1]} : vector<8x128xf32> to vector<8x96xf32>
    %275 = arith.negf %274 : vector<8x96xf32>
    %276 = math.exp %275 : vector<8x96xf32>
    %cst_104 = arith.constant 1.000000e+00 : f32
    %277 = vector.broadcast %cst_104 : f32 to vector<8x96xf32>
    %278 = arith.addf %277, %276 : vector<8x96xf32>
    %279 = arith.divf %277, %278 : vector<8x96xf32>
    %280 = vector.extract_strided_slice %279 {offsets = [0, 0], sizes = [8, 32], strides = [1, 1]} : vector<8x96xf32> to vector<8x32xf32>
    %281 = vector.extract_strided_slice %279 {offsets = [0, 32], sizes = [8, 32], strides = [1, 1]} : vector<8x96xf32> to vector<8x32xf32>
    %282 = vector.extract_strided_slice %279 {offsets = [0, 64], sizes = [8, 32], strides = [1, 1]} : vector<8x96xf32> to vector<8x32xf32>
    %283 = vector.extract_strided_slice %273 {offsets = [0, 96], sizes = [8, 32], strides = [1, 1]} : vector<8x128xf32> to vector<8x32xf32>
    %284 = math.tanh %283 : vector<8x32xf32>
    %285 = arith.addf %270, %10 : vector<8x32xf32>
    %286 = math.tanh %285 : vector<8x32xf32>
    %c0_105 = arith.constant 0 : index
    %287 = arith.index_cast %266 : i32 to index
    %c16_106 = arith.constant 16 : index
    %288 = vector.load %arg2[%c0_105, %287, %c16_106] : memref<1x64x18xf32, #tpu.memory_space<vmem>>, vector<1x8x1xf32>
    %289 = vector.shape_cast %288 : vector<1x8x1xf32> to vector<8x1xf32>
    %290 = arith.subf %260, %286 : vector<8x32xf32>
    %291 = vector.broadcast %289 : vector<8x1xf32> to vector<8x32xf32>
    %292 = arith.mulf %286, %291 : vector<8x32xf32>
    %293 = arith.addf %290, %292 : vector<8x32xf32>
    %294 = arith.mulf %281, %293 : vector<8x32xf32>
    %295 = arith.mulf %280, %284 : vector<8x32xf32>
    %296 = arith.addf %294, %295 : vector<8x32xf32>
    %297 = math.tanh %296 : vector<8x32xf32>
    %298 = arith.mulf %282, %297 : vector<8x32xf32>
    %299 = arith.index_cast %266 : i32 to index
    %c0_107 = arith.constant 0 : index
    %300 = vector.load %arg15[%299, %c0_107] : memref<64x32xf32, #tpu.memory_space<vmem>>, vector<8x32xf32>
    tpu.vector_store %arg15[%299, %c0_107], %298 {strides = array<i32>} : memref<64x32xf32, #tpu.memory_space<vmem>>, vector<8x32xf32>,
    %c8_i32_108 = arith.constant 8 : i32
    %c0_109 = arith.constant 0 : index
    %c0_110 = arith.constant 0 : index
    %301 = vector.load %arg12[%c0_109, %c0_110] : memref<8x32xf32, #tpu.memory_space<vmem>>, vector<8x32xf32>
    tpu.vector_store %arg12[%c0_109, %c0_110], %298 {strides = array<i32>} : memref<8x32xf32, #tpu.memory_space<vmem>>, vector<8x32xf32>,
    %c0_111 = arith.constant 0 : index
    %c0_112 = arith.constant 0 : index
    %302 = vector.load %arg13[%c0_111, %c0_112] : memref<8x32xf32, #tpu.memory_space<vmem>>, vector<8x32xf32>
    tpu.vector_store %arg13[%c0_111, %c0_112], %296 {strides = array<i32>} : memref<8x32xf32, #tpu.memory_space<vmem>>, vector<8x32xf32>,
    %c0_113 = arith.constant 0 : index
    %c0_114 = arith.constant 0 : index
    %303 = vector.load %arg15[%c0_113, %c0_114] : memref<64x32xf32, #tpu.memory_space<vmem>>, vector<64x32xf32>
    %c0_115 = arith.constant 0 : index
    %c0_116 = arith.constant 0 : index
    %304 = vector.load %arg7[%c0_115, %c0_116] : memref<32x16xf32, #tpu.memory_space<vmem>>, vector<32x16xf32>
    %cst_117 = arith.constant dense<0.000000e+00> : vector<64x16xf32>
    %305 = tpu.matmul %303, %304, %cst_117 {dimension_numbers = #tpu.dot_dimension_numbers<[1], [0], [0], [1], [0, 0, 1, 1], [], []>} : vector<64x32xf32>, vector<32x16xf32>, vector<64x16xf32> -> vector<64x16xf32>
    %c0_118 = arith.constant 0 : index
    %c0_119 = arith.constant 0 : index
    %306 = vector.load %arg8[%c0_118, %c0_119] : memref<1x16xf32, #tpu.memory_space<vmem>>, vector<1x16xf32>
    %307 = vector.broadcast %306 : vector<1x16xf32> to vector<64x16xf32>
    %308 = arith.addf %305, %307 : vector<64x16xf32>
    %cst_120 = arith.constant 0.000000e+00 : f32
    %309 = vector.broadcast %cst_120 : f32 to vector<64x16xf32>
    %310 = arith.maximumf %308, %309 : vector<64x16xf32>
    %c0_121 = arith.constant 0 : index
    %c0_122 = arith.constant 0 : index
    %311 = vector.load %arg9[%c0_121, %c0_122] : memref<16x128xf32, #tpu.memory_space<vmem>>, vector<16x128xf32>
    %cst_123 = arith.constant dense<0.000000e+00> : vector<64x128xf32>
    %312 = tpu.matmul %310, %311, %cst_123 {dimension_numbers = #tpu.dot_dimension_numbers<[1], [0], [0], [1], [0, 0, 1, 1], [], []>} : vector<64x16xf32>, vector<16x128xf32>, vector<64x128xf32> -> vector<64x128xf32>
    %c0_124 = arith.constant 0 : index
    %c0_125 = arith.constant 0 : index
    %313 = vector.load %arg10[%c0_124, %c0_125] : memref<1x128xf32, #tpu.memory_space<vmem>>, vector<1x128xf32>
    %314 = vector.broadcast %313 : vector<1x128xf32> to vector<64x128xf32>
    %315 = arith.addf %312, %314 : vector<64x128xf32>
    %316 = arith.negf %315 : vector<64x128xf32>
    %317 = math.exp %316 : vector<64x128xf32>
    %cst_126 = arith.constant 1.000000e+00 : f32
    %318 = vector.broadcast %cst_126 : f32 to vector<64x128xf32>
    %319 = arith.addf %318, %317 : vector<64x128xf32>
    %320 = arith.divf %318, %319 : vector<64x128xf32>
    %c0_127 = arith.constant 0 : index
    %c0_128 = arith.constant 0 : index
    %c0_129 = arith.constant 0 : index
    %321 = vector.load %arg11[%c0_127, %c0_128, %c0_129] : memref<1x64x128xf32, #tpu.memory_space<vmem>>, vector<1x64x128xf32>
    %322 = vector.shape_cast %321 : vector<1x64x128xf32> to vector<64x128xf32>
    %323 = vector.shape_cast %320 : vector<64x128xf32> to vector<1x64x128xf32>
    tpu.vector_store %arg11[%c0_127, %c0_128, %c0_129], %323 {strides = array<i32>} : memref<1x64x128xf32, #tpu.memory_space<vmem>>, vector<1x64x128xf32>,
    return
  }
  func.func @transform_0(%arg0: i32, %arg1: i32) -> (i32, i32, i32) {
    %c0_i32 = arith.constant 0 : i32
    %c0_i32_0 = arith.constant 0 : i32
    return %arg0, %arg1, %c0_i32 : i32, i32, i32
  }
  func.func @transform_1(%arg0: i32, %arg1: i32) -> (i32, i32) {
    %c0_i32 = arith.constant 0 : i32
    %c0_i32_0 = arith.constant 0 : i32
    %c0_i32_1 = arith.constant 0 : i32
    return %c0_i32, %c0_i32_0 : i32, i32
  }
  func.func @transform_2(%arg0: i32, %arg1: i32) -> (i32, i32) {
    %c0_i32 = arith.constant 0 : i32
    %c0_i32_0 = arith.constant 0 : i32
    %c0_i32_1 = arith.constant 0 : i32
    return %c0_i32, %c0_i32_0 : i32, i32
  }
  func.func @transform_3(%arg0: i32, %arg1: i32) -> (i32, i32) {
    %c0_i32 = arith.constant 0 : i32
    %c0_i32_0 = arith.constant 0 : i32
    %c0_i32_1 = arith.constant 0 : i32
    return %c0_i32, %c0_i32_0 : i32, i32
  }
  func.func @transform_4(%arg0: i32, %arg1: i32) -> (i32, i32) {
    %c0_i32 = arith.constant 0 : i32
    %c0_i32_0 = arith.constant 0 : i32
    %c0_i32_1 = arith.constant 0 : i32
    return %c0_i32, %c0_i32_0 : i32, i32
  }
  func.func @transform_5(%arg0: i32, %arg1: i32) -> (i32, i32) {
    %c0_i32 = arith.constant 0 : i32
    %c0_i32_0 = arith.constant 0 : i32
    %c0_i32_1 = arith.constant 0 : i32
    return %c0_i32, %c0_i32_0 : i32, i32
  }
  func.func @transform_6(%arg0: i32, %arg1: i32) -> (i32, i32) {
    %c0_i32 = arith.constant 0 : i32
    %c0_i32_0 = arith.constant 0 : i32
    %c0_i32_1 = arith.constant 0 : i32
    return %c0_i32, %c0_i32_0 : i32, i32
  }
  func.func @transform_7(%arg0: i32, %arg1: i32) -> (i32, i32) {
    %c0_i32 = arith.constant 0 : i32
    %c0_i32_0 = arith.constant 0 : i32
    %c0_i32_1 = arith.constant 0 : i32
    return %c0_i32, %c0_i32_0 : i32, i32
  }
  func.func @transform_8(%arg0: i32, %arg1: i32) -> (i32, i32) {
    %c0_i32 = arith.constant 0 : i32
    %c0_i32_0 = arith.constant 0 : i32
    %c0_i32_1 = arith.constant 0 : i32
    return %c0_i32, %c0_i32_0 : i32, i32
  }
  func.func @transform_9(%arg0: i32, %arg1: i32) -> (i32, i32, i32) {
    %c0_i32 = arith.constant 0 : i32
    %c0_i32_0 = arith.constant 0 : i32
    return %arg0, %arg1, %c0_i32 : i32, i32, i32
  }
}

</mosaic_0001>

<bundles_post_ra>
// kernel: tpu_custom_call.1
= control target key start
LH: loop header
LB: loop body
LE: loop exit
PB: predicated region body
PF: predicated region fallthrough
CT: control target
= control target key end

     0   :  { %14 = vsyncpa [#allocation7], 0  ;;  %s2761_s0 = inlined_call_operand.vmem [shape: f32[2,128,18], index: 0, kind: input, shape index: {}]   ;;  %s2762_s1 = inlined_call_operand.vmem [shape: f32[18,128], index: 1, kind: input, shape index: {}]   ;;  %s2763_s2 = inlined_call_operand.vmem [shape: f32[32,128], index: 2, kind: input, shape index: {}]   ;;  %s2764_s3 = inlined_call_operand.vmem [shape: f32[32,32], index: 3, kind: input, shape index: {}]   ;;  %s2765_s4 = inlined_call_operand.vmem [shape: f32[1,32], index: 4, kind: input, shape index: {}]   ;;  %s2766_s5 = inlined_call_operand.vmem [shape: f32[32,16], index: 5, kind: input, shape index: {}]   ;;  %s2767_s6 = inlined_call_operand.vmem [shape: f32[1,16], index: 6, kind: input, shape index: {}]   ;;  %s2768_s7 = inlined_call_operand.vmem [shape: f32[16,128], index: 7, kind: input, shape index: {}]   ;;  %s2769_s8 = inlined_call_operand.vmem [shape: f32[1,128], index: 8, kind: input, shape index: {}]   ;;  %s2770_s9 = inlined_call_operand.hbm [shape: f32[2,128,128], index: 9, kind: output, shape index: {}]  }
   0x1   :  { %16 = vsyncpa [#allocation7 + $0x1], 0  ;;  %s2279_s30 = smov 0   ;;  %s2281_s10 = smov 0  }
   0x2   :  { %s2283_s11 = smov 0   ;;  %s2285_s12 = smov 0  }
   0x3   :  { %s2287_s13 = smov 0   ;;  %s2289_s14 = smov 0  }
   0x4   :  { %s2291_s15 = smov 0   ;;  %s2293_s16 = smov 0  }
   0x5 LB: > { %2776 = sst [smem:[#allocation9_spill]] %s2212_s14  ;;  %s1844_s17 = sadd.s32 4294967295, %s2220_s16   ;;  %s2220_s16 = sphi %s2293_s16, %s22_s16   ;;  %s2216_s15 = sphi %s2291_s15, %s2788_s15   ;;  %s2212_s14 = sphi %s2289_s14, %s2787_s14   ;;  %s2208_s13 = sphi %s2287_s13, %s2792_s13   ;;  %s2204_s12 = sphi %s2285_s12, %s2785_s12   ;;  %s2200_s11 = sphi %s2283_s11, %s2791_s11   ;;  %s2196_s10 = sphi %s2281_s10, %s2790_s10   ;;  %s2192_s30 = sphi %s2279_s30, %s2789_s30  }
   0x6   : > { %2777 = sst [smem:[#allocation10_spill]] %s2216_s15  ;;  %s1845_s18 = sadd.s32 4294967294, %s2220_s16  }
   0x7   : > { %s31_s19 = sadd.s32 1, %s2212_s14  ;;  %s34_s20 = sadd.s32 1, %s2216_s15 }
   0x8   : > { %p32_p0 = scmp.ge.s32.totalorder %s31_s19, 2  ;;  %p249_p1 = scmp.ne.s32.totalorder %s2200_s11, %s2196_s10 }
   0x9   : > { %p250_p2 = scmp.eq.s32.totalorder %s1844_s17, 3  ;;  %p255_p5 = scmp.ne.s32.totalorder %s2196_s10, %s2192_s30 }
   0xa   : > { %s2794_s19 = smov (%p32_p0, %s31_s19), 0  ;;  %s2796_s20 = smov (!%p32_p0, %s34_s20), %s2216_s15 }
   0xb   : > { %2778 = sst [smem:[#allocation11_spill]] %s2794_s19  ;;  %s235_s21 = ssub.s32 %s2212_s14, %s2794_s19 }
   0xc   : > { %p2330_p3 = por %p250_p2, %p249_p1  ;;  %p36_p4 = scmp.ge.s32.totalorder %s2796_s20, 2 }
   0xd   : > { %p256_p6 = scmp.eq.s32.totalorder %s1845_s18, 3  ;;  %p1848_p7 = scmp.ge.s32.totalorder %s2220_s16, 1 }
   0xe   : > { %s2798_s20 = smov (%p36_p4, %s2796_s20), 0  ;;  %p311_p9 = scmp.lt.s32.totalorder %s2220_s16, 5 }
   0xf   : > { %2780 = sst [smem:[#allocation12_spill]] %s2798_s20  ;;  %p2339_p8 = por %p256_p6, %p255_p5 }
  0x10   : > { %s234_s24 = ssub.s32 %s2216_s15, %s2798_s20  ;;  %s239_s25 = sadd.s32 1, %s2200_s11 }
  0x11   : > { %s236_s26 = sor.u32 %s235_s21, %s234_s24  ;;  %p312_p10 = pnand %p1848_p7, %p311_p9 }
  0x12   : > { %p237_p11 = scmp.eq.s32.totalorder %s236_s26, 0  ;;  %s2775_s28 = sand.u32 (!%p312_p10), 1, %s2196_s10  }
  0x13   : > { %315 = sbr.rel (%p312_p10) target bundleno = 4958 (0x135e), region = 56  ;;  %s2352_s29 = sshll.u32 (!%p312_p10), %s2204_s12, 3 }
  0x14   : > { %s2348_s27 = scalar_select %p237_p11, %s2200_s11, %s239_s25  }
  0x15   : > { %s1849_s17 = sshll.u32 (!%p312_p10), %s2775_s28, 6  ;;  %p352_p12 = scmp.lt.s32.totalorder (!%p312_p10), %s2208_s13, 1 }
  0x16   : > { %2782 = sst [smem:[#allocation13_spill]] %s2348_s27  ;;  %p354_p13 = scmp.lt.s32.totalorder (!%p312_p10), %s2352_s29, 15 }
  0x17   : > { %s2365_s14 = scalar_lea.vmem (!%p312_p10), [#allocation6], %s1849_s17  ;;  %p1853_p0 = scmp.ne.s32.totalorder (!%p312_p10), %s2204_s12, 0 }
  0x18   : > { %s353_s18 = scalar_select %p352_p12, %s2208_s13, 1 }
  0x19   : > { %s355_s21 = scalar_select %p354_p13, %s2352_s29, 15 }
  0x1a   : > { %s1851_s24 = sshll.u32 %s353_s18, 4  ;;  %365 = sbr.rel (%p1853_p0) target bundleno = 34 (0x22), region = 60 }
  0x1b   : > { %s357_s25 = sadd.s32 %s1851_s24, %s355_s21 }
  0x1c   : > { %s1852_s26 = sshll.u32 %s357_s25, 3 }
  0x1d   : > { %s2363_s15 = scalar_lea.vmem %s2761_s0, %s1852_s26 }
  0x1f   : > { %vm366_vm0 = vcmask 261120   ;;  %v2222_v0 = vmov 0.0  }
  0x20   : > { %367 = vst.msk [vmem:[#allocation2] sm:$0xff] %vm366_vm0, %v2222_v0 }
  0x21   : > { %368 = vst.msk [vmem:[#allocation3] sm:$0xff] %vm366_vm0, %v2222_v0 }
  0x22 PF: > { %v2371_v1 = vld [vmem:[%s2763_s2 + $0x18] sm:$0xff]  ;;  %v379_v3 = vld [vmem:[%s2762_s1 + $0x10] sm:$0x3]  ;;  %vm405_vm1 = vcmask 1041408   ;;  %v378_v6 = vld [vmem:[%s2762_s1 + $0x8] sm:$0xff]  ;;  %v2223_v9 = vmov 16  }
  0x23   : > { %v2376_v2 = vld [vmem:[%s2764_s3 + $0x18] sm:$0xff]  ;;  %484 = vmatpush.msra.mxu1 %v2371_v1  ;;  %v2386_v4 = vld [vmem:[%s2763_s2 + $0x10] sm:$0xff]  ;;  %1854 = vmatpush.msk.msra.mxu0 %vm405_vm1, %v379_v3  ;;  %v2399_v7 = vld [vmem:[%s2763_s2 + $0x8] sm:$0xff]  ;;  %vm380_vm2 = vcmask 146432   ;;  %vm468_vm3 = vcmask 261120   ;;  %s2224_s18 = smov 32  }
  0x24   : > { %533 = vmatpush.msra.mxu2 %v2376_v2  ;;  %v2391_v5 = vld [vmem:[%s2764_s3 + $0x10] sm:$0xff]  ;;  %v2404_v8 = vld [vmem:[%s2764_s3 + $0x8] sm:$0xff]  ;;  %2008 = vset.pattern.permute.xlu0 %v2223_v9  ;;  %v377_v10 = vld [vmem:[%s2762_s1] sm:$0xff]  ;;  %s2225_s21 = smov 96   ;;  %s2226_s19 = smov 64  }
  0x25   : > { %485 = vmatpush.msra.mxu1 %v2386_v4  ;;  %v369_v11 = vld [vmem:[%s2363_s15] sm:$0xff]  ;;  %423 = vmatpush.msra.mxu0 %v378_v6  ;;  %v1869_v48 = vld [vmem:[%s2363_s15 + $0x8] sm:$0xff]  ;;  %s1759_s20 = sshll.u32 %s2365_s14, 4  ;;  %s1760_s20 = int_to_ptr.vmem [resolvable:$true] %s1759_s20 }
  0x26   : > { %534 = vmatpush.msra.mxu2 %v2391_v5  ;;  %v2415_v12 = vld [vmem:[%s2763_s2] sm:$0xff]  ;;  %546 = vperm.xlu0 %2008, %v369_v11  }
  0x27   : > { %v2420_v13 = vld [vmem:[%s2764_s3] sm:$0xff]  ;;  %486 = vmatpush.msra.mxu1 %v2399_v7  ;;  %424 = vmatpush.msra.mxu0 %v377_v10 }
  0x28   : > { %535 = vmatpush.msra.mxu2 %v2404_v8  ;;  %v462_v14 = vld [vmem:[#allocation2] sm:$0xff]  ;;  %v463_v15 = vld [vmem:[#allocation3] sm:$0xff]  ;;  %2009 = vset.pattern.permute.xlu1 %v2223_v9 }
  0x29   : > { %487 = vmatpush.msra.mxu1 %v2415_v12  ;;  %1855 = vmatmul.msk.f32.vlgmr.msra.gmra.mxu0 %vm380_vm2, %v369_v11  ;;  %v2456_v19 = vld [vmem:[%s2765_s4] ss:$0 sm:$0xff] }
  0x2a   : > { %536 = vmatpush.msra.mxu2 %v2420_v13  ;;  %1863 = vmatmul.msk.f32.vlgmr.msra.gmra.mxu1 %vm468_vm3, %v462_v14 }
  0x2b   : > { %1865 = vmatmul.msk.f32.vlgmr.msra.gmra.mxu2 %vm468_vm3, %v463_v15  ;;  %647 = vmatpush.msrb.mxu1 %v2376_v2 }
  0x2c   : > { %595 = vmatpush.msra.mxu3 %v2371_v1  ;;  %715 = vmatpush.msrb.mxu2 %v2371_v1 }
  0x2d   : > { %648 = vmatpush.msrb.mxu1 %v2391_v5  ;;  %2010 = vset.pattern.permute.xlu2 %v2223_v9 }
  0x2e   : > { %596 = vmatpush.msra.mxu3 %v2386_v4  ;;  %716 = vmatpush.msrb.mxu2 %v2386_v4 }
  0x2f   : > { %649 = vmatpush.msrb.mxu1 %v2404_v8 }
  0x30   : > { %597 = vmatpush.msra.mxu3 %v2399_v7  ;;  %717 = vmatpush.msrb.mxu2 %v2399_v7 }
  0x31   : > { %650 = vmatpush.msrb.mxu1 %v2420_v13  ;;  %1856 = vmatmul.msk.f32.gmra.mxu0 %vm380_vm2, %v1869_v48 }
  0x32   : > { %598 = vmatpush.msra.mxu3 %v2415_v12  ;;  %718 = vmatpush.msrb.mxu2 %v2415_v12 }
  0x33   : > { %835 = vmatpush.msra.mxu1 %v2371_v1 }
  0x34   : > { %767 = vmatpush.msrb.mxu3 %v2376_v2  ;;  %887 = vmatpush.msra.mxu2 %v2376_v2 }
  0x35   : > { %836 = vmatpush.msra.mxu1 %v2386_v4 }
  0x36   : > { %768 = vmatpush.msrb.mxu3 %v2391_v5  ;;  %888 = vmatpush.msra.mxu2 %v2391_v5 }
  0x37   : > { %837 = vmatpush.msra.mxu1 %v2399_v7 }
  0x38   : > { %769 = vmatpush.msrb.mxu3 %v2404_v8  ;;  %889 = vmatpush.msra.mxu2 %v2404_v8 }
  0x39   : > { %838 = vmatpush.msra.mxu1 %v2415_v12 }
  0x3a   : > { %770 = vmatpush.msrb.mxu3 %v2420_v13  ;;  %890 = vmatpush.msra.mxu2 %v2420_v13 }
  0x98   : > { %v547_v23 = vpop.permute.xlu0 %546 }
  0xa6   : > { %v426_v16 = vpop.f32.mrf.mxu0 }
  0xa7   : > { %v489_v17 = vpop.f32.mrf.mxu1 }
  0xa8   : > { %v497_v18 = vadd.f32 %v489_v17, %v426_v16 }
  0xaa   : > { %2014 = vtanh.f32 %v497_v18  ;;  %v1864_v28 = vmul.f32 -1.442695, %v497_v18 }
  0xae   : > { %v538_v20 = vpop.f32.mrf.mxu2  ;;  %v429_v58 = vpop.f32.mrf.mxu0 }
  0xaf   : > { %v539_v21 = vadd.f32 %v2456_v19, %v538_v20 }
  0xb0   : > { %v2015_v22 = vpop.eup %2014 }
  0xb1   : > { %2016 = vtanh.f32 %v539_v21  ;;  %557 = vrot.lane.b32.xlu0 %v2015_v22, %s2224_s18  ;;  %v1873_v22 = vld [vmem:[%s2363_s15 + $0x10] sm:$0xff] }
  0xb2   : > { %2018 = vpow2.f32 %v1864_v28  ;;  %1857 = vmatmul.msk.f32.gmra.mxu0 %vm380_vm2, %v1873_v22 }
  0xb7   : > { %v2017_v24 = vpop.eup %2016 }
  0xb8   : > { %v549_v25 = vmul.f32 %v2017_v24, %v547_v23  ;;  %v543_v26 = vsub.f32 %v463_v15, %v2017_v24  ;;  %v2019_v29 = vpop.eup %2018 }
  0xb9   : > { %v501_v30 = vadd.f32 1.0, %v2019_v29 }
  0xba   : > { %v550_v27 = vadd.f32 %v549_v25, %v543_v26 }
  0xbb   : > { %2020 = vrcp.f32 %v501_v30  ;;  %v513_v36 = vand.u32 2147483648, %v501_v30  ;;  %vm507_vm5 = vweird.f32 %v501_v30  ;;  %v511_v37 = vand.u32 2147483647, %v501_v30 }
  0xbc   : > { %552 = vrot.lane.b32.xlu1 %v550_v27, %s2224_s18 }
  0xbd   : > { %v514_v39 = vor.u32 1.1754944e-38, %v513_v36  ;;  %vm512_vm7 = vcmp.eq.f32.partialorder %v511_v37, 8.507059e+37 }
  0xc1   : > { %v2021_v31 = vpop.eup %2020 }
  0xc2   : > { %v503_v32 = vmul.f32 %v2021_v31, %v501_v30  ;;  %vm508_vm4 = vweird.f32 %v2021_v31 }
  0xc3   : > { %vm509_vm6 = vmor %vm507_vm5, %vm508_vm4 }
  0xc4   : > { %v504_v33 = vsub.f32 1.0, %v503_v32 }
  0xc6   : > { %v505_v34 = vmul.f32 %v2021_v31, %v504_v33 }
  0xc8   : > { %v506_v35 = vadd.f32 %v2021_v31, %v505_v34 }
  0xca   : > { %v510_v38 = vsel %vm509_vm6, %v2021_v31, %v506_v35 }
  0xcb   : > { %v515_v41 = vsel %vm512_vm7, %v514_v39, %v510_v38 }
 0x123   : > { %v558_v40 = vpop.permute.xlu0 %557 }
 0x124   : > { %v560_v42 = vmul.f32 %v558_v40, %v515_v41 }
 0x126   : > { %562 = vrot.lane.b32.xlu1 %v560_v42, %s2224_s18 }
 0x12e   : > { %v553_v43 = vpop.permute.xlu1 %552  ;;  %665 = vperm.xlu1 %2009, %v1869_v48  }
 0x12f   : > { %v555_v44 = vmul.f32 %v553_v43, %v515_v41  ;;  %v432_v40 = vpop.f32.mrf.mxu0 }
 0x198   : > { %v563_v45 = vpop.permute.xlu1 %562 }
 0x199   : > { %v2462_v46 = vadd.f32 %v563_v45, %v555_v44 }
 0x19b   : > { %2022 = vtanh.f32 %v2462_v46  ;;  %631 = vrot.lane.b32.xlu0 %v2462_v46, %s2225_s21 }
 0x1a0   : > { %v666_v55 = vpop.permute.xlu1 %665 }
 0x1a1   : > { %v2023_v47 = vpop.eup %2022 }
 0x1a2   : > { %568 = vrot.lane.b32.xlu2 %v2023_v47, %s2224_s18 }
 0x1fc   : > { %v569_v49 = vpop.permute.xlu2 %568 }
 0x1fd   : > { %v571_v50 = vmul.f32 %v569_v49, %v515_v41 }
 0x1ff   : > { %573 = vrot.lane.b32.xlu2 %v571_v50, %s2226_s19 }
 0x20d   : > { %v632_v51 = vpop.permute.xlu0 %631 }
 0x20e   : > { %1868 = vmatmul.msk.f32.vlgmr.msrb.gmra.mxu1 %vm468_vm3, %v632_v51 }
 0x20f   : > { %1007 = vmatpush.msrb.mxu1 %v2376_v2 }
 0x211   : > { %1008 = vmatpush.msrb.mxu1 %v2391_v5 }
 0x213   : > { %1009 = vmatpush.msrb.mxu1 %v2404_v8 }
 0x215   : > { %1010 = vmatpush.msrb.mxu1 %v2420_v13 }
 0x259   : > { %v574_v52 = vpop.permute.xlu2 %573 }
 0x25a   : > { %576 = vst.msk [vmem:[#allocation5] sm:$0xff] %vm468_vm3, %v574_v52  ;;  %1866 = vmatmul.msk.f32.vlgmr.msra.gmra.mxu3 %vm468_vm3, %v574_v52 }
 0x25b   : > { %955 = vmatpush.msra.mxu3 %v2371_v1 }
 0x25d   : > { %956 = vmatpush.msra.mxu3 %v2386_v4 }
 0x25f   : > { %957 = vmatpush.msra.mxu3 %v2399_v7 }
 0x261   : > { %958 = vmatpush.msra.mxu3 %v2415_v12 }
 0x28b   : > { %v652_v53 = vpop.f32.mrf.mxu1 }
 0x28c   : > { %v653_v54 = vadd.f32 %v2456_v19, %v652_v53 }
 0x28e   : > { %2024 = vtanh.f32 %v653_v54 }
 0x294   : > { %v2025_v56 = vpop.eup %2024 }
 0x295   : > { %v668_v57 = vmul.f32 %v2025_v56, %v666_v55  ;;  %659 = vrot.lane.b32.xlu0 %v2025_v56, %s2224_s18 }
 0x297   : > { %670 = vrot.lane.b32.xlu1 %v668_v57, %s2224_s18 }
 0x2dd   : > { %v600_v59 = vpop.f32.mrf.mxu3 }
 0x2de   : > { %v609_v60 = vadd.f32 %v600_v59, %v429_v58 }
 0x2e0   : > { %2026 = vtanh.f32 %v609_v60  ;;  %v1867_v62 = vmul.f32 -1.442695, %v609_v60 }
 0x2e2   : > { %2028 = vpow2.f32 %v1867_v62 }
 0x2e6   : > { %v2027_v61 = vpop.eup %2026 }
 0x2e7   : > { %676 = vrot.lane.b32.xlu2 %v2027_v61, %s2224_s18 }
 0x2e8   : > { %v2029_v63 = vpop.eup %2028 }
 0x2e9   : > { %v613_v0 = vadd.f32 1.0, %v2029_v63 }
 0x2eb   : > { %2030 = vrcp.f32 %v613_v0  ;;  %v625_v14 = vand.u32 2147483648, %v613_v0  ;;  %vm619_vm9 = vweird.f32 %v613_v0  ;;  %v623_v15 = vand.u32 2147483647, %v613_v0 }
 0x2ed   : > { %v626_v17 = vor.u32 1.1754944e-38, %v625_v14  ;;  %vm624_vm11 = vcmp.eq.f32.partialorder %v623_v15, 8.507059e+37 }
 0x2f1   : > { %v2031_v3 = vpop.eup %2030 }
 0x2f2   : > { %v615_v6 = vmul.f32 %v2031_v3, %v613_v0  ;;  %vm620_vm8 = vweird.f32 %v2031_v3 }
 0x2f3   : > { %vm621_vm10 = vmor %vm619_vm9, %vm620_vm8 }
 0x2f4   : > { %v616_v9 = vsub.f32 1.0, %v615_v6 }
 0x2f6   : > { %v617_v10 = vmul.f32 %v2031_v3, %v616_v9  ;;  %v1877_v9 = vld [vmem:[%s2363_s15 + $0x18] sm:$0xff] }
 0x2f7   : > { %1858 = vmatmul.msk.f32.gmra.mxu0 %vm380_vm2, %v1877_v9 }
 0x2f8   : > { %v618_v11 = vadd.f32 %v2031_v3, %v617_v10 }
 0x2fa   : > { %v622_v16 = vsel %vm621_vm10, %v2031_v3, %v618_v11 }
 0x2fb   : > { %v627_v20 = vsel %vm624_vm11, %v626_v17, %v622_v16 }
 0x307   : > { %v660_v23 = vpop.permute.xlu0 %659 }
 0x308   : > { %v662_v24 = vsub.f32 %v2462_v46, %v660_v23 }
 0x309   : > { %v671_v25 = vpop.permute.xlu1 %670 }
 0x30a   : > { %v673_v26 = vadd.f32 %v671_v25, %v662_v24 }
 0x30c   : > { %v674_v27 = vmul.f32 %v673_v26, %v627_v20 }
 0x341   : > { %v677_v18 = vpop.permute.xlu2 %676 }
 0x342   : > { %v679_v21 = vmul.f32 %v677_v18, %v627_v20 }
 0x344   : > { %681 = vrot.lane.b32.xlu2 %v679_v21, %s2224_s18 }
 0x374   : > { %v435_v17 = vpop.f32.mrf.mxu0 }
 0x39e   : > { %v682_v28 = vpop.permute.xlu2 %681 }
 0x39f   : > { %v684_v29 = vadd.f32 %v682_v28, %v674_v27 }
 0x3a1   : > { %2032 = vtanh.f32 %v684_v29  ;;  %751 = vrot.lane.b32.xlu2 %v684_v29, %s2225_s21 }
 0x3a7   : > { %v2033_v30 = vpop.eup %2032 }
 0x3a8   : > { %687 = vrot.lane.b32.xlu0 %v2033_v30, %s2224_s18 }
 0x3b0   : > { %785 = vperm.xlu0 %2008, %v1873_v22  }
 0x3fb   : > { %v752_v31 = vpop.permute.xlu2 %751 }
 0x3fc   : > { %1872 = vmatmul.msk.f32.vlgmr.msrb.gmra.mxu3 %vm468_vm3, %v752_v31 }
 0x3fd   : > { %1127 = vmatpush.msrb.mxu3 %v2376_v2 }
 0x3ff   : > { %1128 = vmatpush.msrb.mxu3 %v2391_v5 }
 0x401   : > { %1129 = vmatpush.msrb.mxu3 %v2404_v8 }
 0x403   : > { %1130 = vmatpush.msrb.mxu3 %v2420_v13 }
 0x41a   : > { %v688_v32 = vpop.permute.xlu0 %687 }
 0x41b   : > { %v690_v33 = vmul.f32 %v688_v32, %v627_v20 }
 0x41d   : > { %692 = vrot.lane.b32.xlu1 %v690_v33, %s2226_s19  ;;  %v1881_v33 = vld [vmem:[%s2363_s15 + $0x20] sm:$0xff] }
 0x41e   : > { %1859 = vmatmul.msk.f32.gmra.mxu0 %vm380_vm2, %v1881_v33 }
 0x422   : > { %v786_v37 = vpop.permute.xlu0 %785 }
 0x47f   : > { %v772_v34 = vpop.f32.mrf.mxu3 }
 0x480   : > { %v773_v35 = vadd.f32 %v2456_v19, %v772_v34 }
 0x482   : > { %2034 = vtanh.f32 %v773_v35 }
 0x488   : > { %v2035_v36 = vpop.eup %2034 }
 0x489   : > { %779 = vrot.lane.b32.xlu2 %v2035_v36, %s2224_s18  ;;  %v788_v38 = vmul.f32 %v2035_v36, %v786_v37 }
 0x48b   : > { %790 = vrot.lane.b32.xlu0 %v788_v38, %s2224_s18 }
 0x48f   : > { %v693_v39 = vpop.permute.xlu1 %692 }
 0x490   : > { %696 = vst.msk [vmem:[#allocation5 + $0x8] sm:$0xff] %vm468_vm3, %v693_v39  ;;  %1870 = vmatmul.msk.f32.vlgmr.msrb.gmra.mxu2 %vm468_vm3, %v693_v39 }
 0x491   : > { %1075 = vmatpush.msrb.mxu2 %v2371_v1 }
 0x493   : > { %1076 = vmatpush.msrb.mxu2 %v2386_v4 }
 0x495   : > { %1077 = vmatpush.msrb.mxu2 %v2399_v7 }
 0x497   : > { %1078 = vmatpush.msrb.mxu2 %v2415_v12 }
 0x4e3   : > { %v780_v59 = vpop.permute.xlu2 %779 }
 0x4e4   : > { %v782_v61 = vsub.f32 %v684_v29, %v780_v59 }
 0x4fd   : > { %v791_v60 = vpop.permute.xlu0 %790 }
 0x4fe   : > { %v793_v62 = vadd.f32 %v791_v60, %v782_v61 }
 0x513   : > { %v720_v41 = vpop.f32.mrf.mxu2 }
 0x514   : > { %v729_v42 = vadd.f32 %v720_v41, %v432_v40 }
 0x516   : > { %2036 = vtanh.f32 %v729_v42  ;;  %v1871_v44 = vmul.f32 -1.442695, %v729_v42 }
 0x518   : > { %2038 = vpow2.f32 %v1871_v44 }
 0x51c   : > { %v2037_v43 = vpop.eup %2036 }
 0x51d   : > { %796 = vrot.lane.b32.xlu1 %v2037_v43, %s2224_s18 }
 0x51e   : > { %v2039_v45 = vpop.eup %2038 }
 0x51f   : > { %v733_v46 = vadd.f32 1.0, %v2039_v45 }
 0x521   : > { %2040 = vrcp.f32 %v733_v46  ;;  %v745_v52 = vand.u32 2147483648, %v733_v46  ;;  %vm739_vm13 = vweird.f32 %v733_v46  ;;  %v743_v53 = vand.u32 2147483647, %v733_v46 }
 0x523   : > { %v746_v55 = vor.u32 1.1754944e-38, %v745_v52  ;;  %vm744_vm15 = vcmp.eq.f32.partialorder %v743_v53, 8.507059e+37 }
 0x527   : > { %v2041_v47 = vpop.eup %2040 }
 0x528   : > { %v735_v48 = vmul.f32 %v2041_v47, %v733_v46  ;;  %vm740_vm12 = vweird.f32 %v2041_v47 }
 0x529   : > { %vm741_vm14 = vmor %vm739_vm13, %vm740_vm12 }
 0x52a   : > { %v736_v49 = vsub.f32 1.0, %v735_v48 }
 0x52c   : > { %v737_v50 = vmul.f32 %v2041_v47, %v736_v49 }
 0x52e   : > { %v738_v51 = vadd.f32 %v2041_v47, %v737_v50 }
 0x530   : > { %v742_v54 = vsel %vm741_vm14, %v2041_v47, %v738_v51  ;;  %v438_v51 = vpop.f32.mrf.mxu0 }
 0x531   : > { %v747_v57 = vsel %vm744_vm15, %v746_v55, %v742_v54 }
 0x532   : > { %v794_v63 = vmul.f32 %v793_v62, %v747_v57 }
 0x58f   : > { %v797_v56 = vpop.permute.xlu1 %796 }
 0x590   : > { %v799_v58 = vmul.f32 %v797_v56, %v747_v57 }
 0x592   : > { %801 = vrot.lane.b32.xlu1 %v799_v58, %s2224_s18 }
 0x604   : > { %v802_v0 = vpop.permute.xlu1 %801 }
 0x605   : > { %v2509_v3 = vadd.f32 %v802_v0, %v794_v63 }
 0x607   : > { %2042 = vtanh.f32 %v2509_v3  ;;  %871 = vrot.lane.b32.xlu1 %v2509_v3, %s2225_s21 }
 0x60d   : > { %v2043_v6 = vpop.eup %2042 }
 0x60e   : > { %807 = vrot.lane.b32.xlu2 %v2043_v6, %s2224_s18 }
 0x616   : > { %905 = vperm.xlu2 %2010, %v1877_v9  }
 0x668   : > { %v808_v10 = vpop.permute.xlu2 %807 }
 0x669   : > { %v810_v11 = vmul.f32 %v808_v10, %v747_v57 }
 0x66b   : > { %812 = vrot.lane.b32.xlu0 %v810_v11, %s2226_s19 }
 0x679   : > { %v872_v14 = vpop.permute.xlu1 %871 }
 0x67a   : > { %1876 = vmatmul.msk.f32.vlgmr.msra.gmra.mxu2 %vm468_vm3, %v872_v14  ;;  %v1885_v14 = vld [vmem:[%s2363_s15 + $0x28] sm:$0xff] }
 0x67b   : > { %1247 = vmatpush.msra.mxu2 %v2376_v2  ;;  %1860 = vmatmul.msk.f32.gmra.mxu0 %vm380_vm2, %v1885_v14 }
 0x67d   : > { %1248 = vmatpush.msra.mxu2 %v2391_v5 }
 0x67f   : > { %1249 = vmatpush.msra.mxu2 %v2404_v8  ;;  %v906_v8 = vpop.permute.xlu2 %905 }
 0x681   : > { %1250 = vmatpush.msra.mxu2 %v2420_v13 }
 0x6dd   : > { %v813_v15 = vpop.permute.xlu0 %812 }
 0x6de   : > { %816 = vst.msk [vmem:[#allocation5 + $0x10] sm:$0xff] %vm468_vm3, %v813_v15  ;;  %1874 = vmatmul.msk.f32.vlgmr.msra.gmra.mxu1 %vm468_vm3, %v813_v15 }
 0x6df   : > { %1195 = vmatpush.msra.mxu1 %v2371_v1 }
 0x6e1   : > { %1196 = vmatpush.msra.mxu1 %v2386_v4 }
 0x6e3   : > { %1197 = vmatpush.msra.mxu1 %v2399_v7 }
 0x6e5   : > { %1198 = vmatpush.msra.mxu1 %v2415_v12 }
 0x6fd   : > { %v892_v2 = vpop.f32.mrf.mxu2 }
 0x6fe   : > { %v893_v5 = vadd.f32 %v2456_v19, %v892_v2 }
 0x700   : > { %2044 = vtanh.f32 %v893_v5 }
 0x706   : > { %v2045_v16 = vpop.eup %2044 }
 0x707   : > { %v908_v13 = vmul.f32 %v2045_v16, %v906_v8  ;;  %899 = vrot.lane.b32.xlu1 %v2045_v16, %s2224_s18 }
 0x709   : > { %910 = vrot.lane.b32.xlu2 %v908_v13, %s2224_s18 }
 0x75b   : > { %v840_v18 = vpop.f32.mrf.mxu1 }
 0x75c   : > { %v849_v1 = vadd.f32 %v840_v18, %v435_v17 }
 0x75e   : > { %2046 = vtanh.f32 %v849_v1  ;;  %v1875_v7 = vmul.f32 -1.442695, %v849_v1 }
 0x760   : > { %2048 = vpow2.f32 %v1875_v7 }
 0x763   : > { %v911_v36 = vpop.permute.xlu2 %910 }
 0x764   : > { %v2047_v4 = vpop.eup %2046 }
 0x765   : > { %916 = vrot.lane.b32.xlu0 %v2047_v4, %s2224_s18 }
 0x766   : > { %v2049_v12 = vpop.eup %2048 }
 0x767   : > { %v853_v20 = vadd.f32 1.0, %v2049_v12 }
 0x769   : > { %2050 = vrcp.f32 %v853_v20  ;;  %v865_v26 = vand.u32 2147483648, %v853_v20  ;;  %vm859_vm1 = vweird.f32 %v853_v20  ;;  %v863_v27 = vand.u32 2147483647, %v853_v20 }
 0x76b   : > { %v866_v29 = vor.u32 1.1754944e-38, %v865_v26  ;;  %vm864_vm5 = vcmp.eq.f32.partialorder %v863_v27, 8.507059e+37 }
 0x76f   : > { %v2051_v21 = vpop.eup %2050 }
 0x770   : > { %v855_v22 = vmul.f32 %v2051_v21, %v853_v20  ;;  %vm860_vm0 = vweird.f32 %v2051_v21 }
 0x771   : > { %vm861_vm4 = vmor %vm859_vm1, %vm860_vm0 }
 0x772   : > { %v856_v23 = vsub.f32 1.0, %v855_v22 }
 0x774   : > { %v857_v24 = vmul.f32 %v2051_v21, %v856_v23 }
 0x776   : > { %v858_v25 = vadd.f32 %v2051_v21, %v857_v24 }
 0x778   : > { %v862_v28 = vsel %vm861_vm4, %v2051_v21, %v858_v25  ;;  %v441_v25 = vpop.f32.mrf.mxu0 }
 0x779   : > { %v867_v31 = vsel %vm864_vm5, %v866_v29, %v862_v28  ;;  %v900_v34 = vpop.permute.xlu1 %899 }
 0x77a   : > { %v902_v35 = vsub.f32 %v2509_v3, %v900_v34 }
 0x77c   : > { %v913_v37 = vadd.f32 %v911_v36, %v902_v35 }
 0x77e   : > { %v914_v38 = vmul.f32 %v913_v37, %v867_v31 }
 0x7d7   : > { %v917_v30 = vpop.permute.xlu0 %916 }
 0x7d8   : > { %v919_v32 = vmul.f32 %v917_v30, %v867_v31 }
 0x7da   : > { %921 = vrot.lane.b32.xlu0 %v919_v32, %s2224_s18 }
 0x84c   : > { %v922_v39 = vpop.permute.xlu0 %921 }
 0x84d   : > { %v924_v40 = vadd.f32 %v922_v39, %v914_v38 }
 0x84f   : > { %2052 = vtanh.f32 %v924_v40  ;;  %991 = vrot.lane.b32.xlu0 %v924_v40, %s2225_s21 }
 0x855   : > { %v2053_v41 = vpop.eup %2052 }
 0x856   : > { %927 = vrot.lane.b32.xlu1 %v2053_v41, %s2224_s18 }
 0x85e   : > { %1025 = vperm.xlu1 %2009, %v1881_v33  }
 0x8c1   : > { %v992_v42 = vpop.permute.xlu0 %991 }
 0x8c2   : > { %1880 = vmatmul.msk.f32.vlgmr.msrb.gmra.mxu1 %vm468_vm3, %v992_v42 }
 0x8c8   : > { %v928_v43 = vpop.permute.xlu1 %927 }
 0x8c9   : > { %v930_v44 = vmul.f32 %v928_v43, %v867_v31 }
 0x8cb   : > { %932 = vrot.lane.b32.xlu2 %v930_v44, %s2226_s19  ;;  %v1889_v44 = vld [vmem:[%s2363_s15 + $0x30] sm:$0xff] }
 0x8cc   : > { %1861 = vmatmul.msk.f32.gmra.mxu0 %vm380_vm2, %v1889_v44 }
 0x8d0   : > { %v1026_v49 = vpop.permute.xlu1 %1025 }
 0x925   : > { %v933_v45 = vpop.permute.xlu2 %932 }
 0x926   : > { %936 = vst.msk [vmem:[#allocation5 + $0x18] sm:$0xff] %vm468_vm3, %v933_v45  ;;  %1878 = vmatmul.msk.f32.vlgmr.msra.gmra.mxu3 %vm468_vm3, %v933_v45 }
 0x93f   : > { %v1012_v46 = vpop.f32.mrf.mxu1 }
 0x940   : > { %v1013_v47 = vadd.f32 %v2456_v19, %v1012_v46 }
 0x942   : > { %2054 = vtanh.f32 %v1013_v47 }
 0x948   : > { %v2055_v48 = vpop.eup %2054 }
 0x949   : > { %1019 = vrot.lane.b32.xlu0 %v2055_v48, %s2224_s18  ;;  %v1028_v50 = vmul.f32 %v2055_v48, %v1026_v49 }
 0x94b   : > { %1030 = vrot.lane.b32.xlu1 %v1028_v50, %s2224_s18 }
 0x9a9   : > { %v960_v52 = vpop.f32.mrf.mxu3 }
 0x9aa   : > { %v969_v53 = vadd.f32 %v960_v52, %v438_v51 }
 0x9ac   : > { %2056 = vtanh.f32 %v969_v53  ;;  %v1879_v55 = vmul.f32 -1.442695, %v969_v53  ;;  %v2572_v53 = vld [vmem:[%s2766_s5 + $0x18] sm:$0xff] }
 0x9ae   : > { %2058 = vpow2.f32 %v1879_v55  ;;  %v2583_v55 = vld [vmem:[%s2766_s5 + $0x8] sm:$0xff] }
 0x9b2   : > { %v2057_v54 = vpop.eup %2056 }
 0x9b3   : > { %1036 = vrot.lane.b32.xlu2 %v2057_v54, %s2224_s18  ;;  %v2577_v54 = vld [vmem:[%s2766_s5 + $0x10] sm:$0xff] }
 0x9b4   : > { %v2059_v56 = vpop.eup %2058 }
 0x9b5   : > { %v973_v57 = vadd.f32 1.0, %v2059_v56  ;;  %v2589_v56 = vld [vmem:[%s2766_s5] sm:$0xff] }
 0x9b7   : > { %2060 = vrcp.f32 %v973_v57  ;;  %v985_v63 = vand.u32 2147483648, %v973_v57  ;;  %vm979_vm7 = vweird.f32 %v973_v57  ;;  %v983_v0 = vand.u32 2147483647, %v973_v57 }
 0x9b9   : > { %v986_v6 = vor.u32 1.1754944e-38, %v985_v63  ;;  %vm984_vm9 = vcmp.eq.f32.partialorder %v983_v0, 8.507059e+37 }
 0x9bb   : > { %v1020_v15 = vpop.permute.xlu0 %1019 }
 0x9bc   : > { %v1022_v2 = vsub.f32 %v924_v40, %v1020_v15 }
 0x9bd   : > { %v2061_v58 = vpop.eup %2060  ;;  %v1031_v5 = vpop.permute.xlu1 %1030 }
 0x9be   : > { %v975_v59 = vmul.f32 %v2061_v58, %v973_v57  ;;  %vm980_vm6 = vweird.f32 %v2061_v58  ;;  %v1033_v8 = vadd.f32 %v1031_v5, %v1022_v2 }
 0x9bf   : > { %vm981_vm8 = vmor %vm979_vm7, %vm980_vm6 }
 0x9c0   : > { %v976_v60 = vsub.f32 1.0, %v975_v59 }
 0x9c2   : > { %v977_v61 = vmul.f32 %v2061_v58, %v976_v60  ;;  %v1426_v60 = vld [vmem:[#allocation5 + $0x18] sm:$0xff] }
 0x9c4   : > { %v978_v62 = vadd.f32 %v2061_v58, %v977_v61 }
 0x9c6   : > { %v982_v3 = vsel %vm981_vm8, %v2061_v58, %v978_v62 }
 0x9c7   : > { %v987_v10 = vsel %vm984_vm9, %v986_v6, %v982_v3 }
 0x9c8   : > { %v1034_v16 = vmul.f32 %v1033_v8, %v987_v10 }
 0xa0d   : > { %v1037_v9 = vpop.permute.xlu2 %1036 }
 0xa0e   : > { %v1039_v11 = vmul.f32 %v1037_v9, %v987_v10 }
 0xa10   : > { %1041 = vrot.lane.b32.xlu2 %v1039_v11, %s2224_s18  ;;  %v444_v11 = vpop.f32.mrf.mxu0 }
 0xa6a   : > { %v1042_v13 = vpop.permute.xlu2 %1041 }
 0xa6b   : > { %v1044_v17 = vadd.f32 %v1042_v13, %v1034_v16 }
 0xa6d   : > { %2062 = vtanh.f32 %v1044_v17  ;;  %1111 = vrot.lane.b32.xlu2 %v1044_v17, %s2225_s21 }
 0xa73   : > { %v2063_v18 = vpop.eup %2062 }
 0xa74   : > { %1047 = vrot.lane.b32.xlu0 %v2063_v18, %s2224_s18 }
 0xa7c   : > { %1145 = vperm.xlu0 %2008, %v1885_v14  }
 0xac7   : > { %v1112_v1 = vpop.permute.xlu2 %1111 }
 0xac8   : > { %1884 = vmatmul.msk.f32.vlgmr.msrb.gmra.mxu3 %vm468_vm3, %v1112_v1 }
 0xae6   : > { %v1048_v4 = vpop.permute.xlu0 %1047 }
 0xae7   : > { %v1050_v7 = vmul.f32 %v1048_v4, %v987_v10 }
 0xae9   : > { %1052 = vrot.lane.b32.xlu1 %v1050_v7, %s2226_s19 }
 0xaee   : > { %v1146_v22 = vpop.permute.xlu0 %1145 }
 0xb4b   : > { %v1132_v12 = vpop.f32.mrf.mxu3 }
 0xb4c   : > { %v1133_v20 = vadd.f32 %v2456_v19, %v1132_v12 }
 0xb4e   : > { %2064 = vtanh.f32 %v1133_v20 }
 0xb54   : > { %v2065_v21 = vpop.eup %2064 }
 0xb55   : > { %1139 = vrot.lane.b32.xlu2 %v2065_v21, %s2224_s18  ;;  %v1148_v23 = vmul.f32 %v2065_v21, %v1146_v22 }
 0xb57   : > { %1150 = vrot.lane.b32.xlu0 %v1148_v23, %s2224_s18 }
 0xb5b   : > { %v1053_v24 = vpop.permute.xlu1 %1052 }
 0xb5c   : > { %1056 = vst.msk [vmem:[#allocation5 + $0x20] sm:$0xff] %vm468_vm3, %v1053_v24  ;;  %1882 = vmatmul.msk.f32.vlgmr.msrb.gmra.mxu2 %vm468_vm3, %v1053_v24 }
 0xb5d   : > { %1924 = vmatpush.msrb.mxu2 %v2572_v53 }
 0xb5f   : > { %1925 = vmatpush.msrb.mxu2 %v2577_v54 }
 0xb61   : > { %1926 = vmatpush.msrb.mxu2 %v2583_v55 }
 0xb63   : > { %1927 = vmatpush.msrb.mxu2 %v2589_v56  ;;  %v1427_v61 = vld [vmem:[#allocation5 + $0x20] sm:$0xff] }
 0xbaf   : > { %v1140_v45 = vpop.permute.xlu2 %1139 }
 0xbb0   : > { %v1142_v47 = vsub.f32 %v1044_v17, %v1140_v45  ;;  %v1423_v45 = vld [vmem:[#allocation5] sm:$0xff] }
 0xbc9   : > { %v1151_v46 = vpop.permute.xlu0 %1150 }
 0xbca   : > { %v1153_v48 = vadd.f32 %v1151_v46, %v1142_v47  ;;  %v1424_v46 = vld [vmem:[#allocation5 + $0x8] sm:$0xff]  ;;  %v1425_v47 = vld [vmem:[#allocation5 + $0x10] sm:$0xff] }
 0xbdf   : > { %v1080_v26 = vpop.f32.mrf.mxu2 }
 0xbe0   : > { %v1089_v27 = vadd.f32 %v1080_v26, %v441_v25  ;;  %v1893_v25 = vld [vmem:[%s2363_s15 + $0x38] sm:$0xff] }
 0xbe1   : > { %1862 = vmatmul.msk.f32.gmra.mxu0 %vm380_vm2, %v1893_v25  ;;  %v1326_v26 = vld [vmem:[%s2764_s3 + $0x18] sm:$0xff]  ;;  %vm1518_vm2 = vcmask 130048  }
 0xbe2   : > { %2066 = vtanh.f32 %v1089_v27  ;;  %v1883_v29 = vmul.f32 -1.442695, %v1089_v27  ;;  %v1325_v27 = vld [vmem:[%s2764_s3 + $0x10] sm:$0xff]  ;;  %1367 = vmatpush.msrb.mxu1 %v1326_v26 }
 0xbe4   : > { %2068 = vpow2.f32 %v1883_v29  ;;  %v1324_v29 = vld [vmem:[%s2764_s3 + $0x8] sm:$0xff]  ;;  %1368 = vmatpush.msrb.mxu1 %v1325_v27 }
 0xbe6   : > { %1369 = vmatpush.msrb.mxu1 %v1324_v29 }
 0xbe8   : > { %v2067_v28 = vpop.eup %2066 }
 0xbe9   : > { %1156 = vrot.lane.b32.xlu1 %v2067_v28, %s2224_s18 }
 0xbea   : > { %v2069_v30 = vpop.eup %2068 }
 0xbeb   : > { %v1093_v31 = vadd.f32 1.0, %v2069_v30  ;;  %v1323_v30 = vld [vmem:[%s2764_s3] sm:$0xff] }
 0xbec   : > { %1370 = vmatpush.msrb.mxu1 %v1323_v30 }
 0xbed   : > { %2070 = vrcp.f32 %v1093_v31  ;;  %v1105_v37 = vand.u32 2147483648, %v1093_v31  ;;  %vm1099_vm11 = vweird.f32 %v1093_v31  ;;  %v1103_v38 = vand.u32 2147483647, %v1093_v31 }
 0xbef   : > { %v1106_v40 = vor.u32 1.1754944e-38, %v1105_v37  ;;  %vm1104_vm13 = vcmp.eq.f32.partialorder %v1103_v38, 8.507059e+37  ;;  %v1300_v38 = vld [vmem:[%s2763_s2 + $0x18] sm:$0xff] }
 0xbf0   : > { %1315 = vmatpush.msra.mxu3 %v1300_v38 }
 0xbf3   : > { %v2071_v32 = vpop.eup %2070 }
 0xbf4   : > { %v1095_v33 = vmul.f32 %v2071_v32, %v1093_v31  ;;  %vm1100_vm10 = vweird.f32 %v2071_v32 }
 0xbf5   : > { %vm1101_vm12 = vmor %vm1099_vm11, %vm1100_vm10 }
 0xbf6   : > { %v1096_v34 = vsub.f32 1.0, %v1095_v33 }
 0xbf8   : > { %v1097_v35 = vmul.f32 %v2071_v32, %v1096_v34 }
 0xbfa   : > { %v1098_v36 = vadd.f32 %v2071_v32, %v1097_v35 }
 0xbfc   : > { %v1102_v39 = vsel %vm1101_vm12, %v2071_v32, %v1098_v36 }
 0xbfd   : > { %v1107_v42 = vsel %vm1104_vm13, %v1106_v40, %v1102_v39  ;;  %v1299_v39 = vld [vmem:[%s2763_s2 + $0x10] sm:$0xff]  ;;  %v1298_v40 = vld [vmem:[%s2763_s2 + $0x8] sm:$0xff] }
 0xbfe   : > { %v1154_v49 = vmul.f32 %v1153_v48, %v1107_v42  ;;  %1316 = vmatpush.msra.mxu3 %v1299_v39  ;;  %v1513_v48 = vld [vmem:[%s2768_s7 + $0x8] sm:$0xff] }
 0xbff   : > { %1557 = vmatpush.msrb.mxu0 %v1513_v48 }
 0xc00   : > { %1317 = vmatpush.msra.mxu3 %v1298_v40 }
 0xc5b   : > { %v1157_v41 = vpop.permute.xlu1 %1156 }
 0xc5c   : > { %v1159_v43 = vmul.f32 %v1157_v41, %v1107_v42  ;;  %v1297_v41 = vld [vmem:[%s2763_s2] sm:$0xff] }
 0xc5d   : > { %1318 = vmatpush.msra.mxu3 %v1297_v41 }
 0xc5e   : > { %1161 = vrot.lane.b32.xlu1 %v1159_v43, %s2224_s18 }
 0xc5f   : > { %1928 = vmatpush.msrb.mxu3 %v1513_v48 }
 0xcd0   : > { %v1162_v50 = vpop.permute.xlu1 %1161 }
 0xcd1   : > { %v2563_v51 = vadd.f32 %v1162_v50, %v1154_v49  ;;  %v1512_v49 = vld [vmem:[%s2768_s7] sm:$0xff] }
 0xcd2   : > { %1929 = vmatpush.msrb.mxu3 %v1512_v49  ;;  %1558 = vmatpush.msrb.mxu0 %v1512_v49 }
 0xcd3   : > { %2072 = vtanh.f32 %v2563_v51  ;;  %1231 = vrot.lane.b32.xlu1 %v2563_v51, %s2225_s21 }
 0xcd9   : > { %v2073_v52 = vpop.eup %2072 }
 0xcda   : > { %1167 = vrot.lane.b32.xlu2 %v2073_v52, %s2224_s18 }
 0xce2   : > { %1265 = vperm.xlu2 %2010, %v1889_v44  }
 0xd34   : > { %v1168_v57 = vpop.permute.xlu2 %1167 }
 0xd35   : > { %v1170_v58 = vmul.f32 %v1168_v57, %v1107_v42 }
 0xd37   : > { %1172 = vrot.lane.b32.xlu0 %v1170_v58, %s2226_s19 }
 0xd3c   : > { %v1266_v9 = vpop.permute.xlu2 %1265 }
 0xd45   : > { %v1232_v59 = vpop.permute.xlu1 %1231 }
 0xd46   : > { %1888 = vmatmul.msk.f32.vlgmr.msra.gmra.mxu2 %vm468_vm3, %v1232_v59 }
 0xd4e   : > { %1897 = vmatmul.msk.f32.vlgmr.msrb.gmra.mxu2 %vm468_vm3, %v1426_v60 }
 0xd56   : > { %1898 = vmatmul.msk.f32.gmra.mxu2 %vm468_vm3, %v1427_v61 }
 0xda9   : > { %v1173_v62 = vpop.permute.xlu0 %1172 }
 0xdaa   : > { %1176 = vst.msk [vmem:[#allocation5 + $0x28] sm:$0xff] %vm468_vm3, %v1173_v62  ;;  %1886 = vmatmul.msk.f32.vlgmr.msra.gmra.mxu1 %vm468_vm3, %v1173_v62 }
 0xdab   : > { %1475 = vmatpush.msra.mxu1 %v2572_v53 }
 0xdad   : > { %1476 = vmatpush.msra.mxu1 %v2577_v54 }
 0xdaf   : > { %1477 = vmatpush.msra.mxu1 %v2583_v55 }
 0xdb1   : > { %v1428_v63 = vld [vmem:[#allocation5 + $0x28] sm:$0xff]  ;;  %1478 = vmatpush.msra.mxu1 %v2589_v56 }
 0xdb2   : > { %1899 = vmatmul.msk.f32.gmra.mxu2 %vm468_vm3, %v1428_v63 }
 0xdc9   : > { %v1252_v0 = vpop.f32.mrf.mxu2 }
 0xdca   : > { %v1253_v3 = vadd.f32 %v2456_v19, %v1252_v0 }
 0xdcc   : > { %2074 = vtanh.f32 %v1253_v3 }
 0xdd1   : > { %v1489_v50 = vpop.f32.mrf.mxu2 }
 0xdd2   : > { %v2075_v6 = vpop.eup %2074 }
 0xdd3   : > { %1259 = vrot.lane.b32.xlu1 %v2075_v6, %s2224_s18  ;;  %v1268_v10 = vmul.f32 %v2075_v6, %v1266_v9 }
 0xdd5   : > { %1270 = vrot.lane.b32.xlu2 %v1268_v10, %s2224_s18 }
 0xdd9   : > { %v1492_v55 = vpop.f32.mrf.mxu2 }
 0xe27   : > { %v1200_v14 = vpop.f32.mrf.mxu1 }
 0xe28   : > { %v1209_v15 = vadd.f32 %v1200_v14, %v444_v11 }
 0xe2a   : > { %2076 = vtanh.f32 %v1209_v15  ;;  %v1887_v5 = vmul.f32 -1.442695, %v1209_v15 }
 0xe2c   : > { %2078 = vpow2.f32 %v1887_v5 }
 0xe2f   : > { %v1271_v32 = vpop.permute.xlu2 %1270 }
 0xe30   : > { %v2077_v2 = vpop.eup %2076 }
 0xe31   : > { %1276 = vrot.lane.b32.xlu0 %v2077_v2, %s2224_s18 }
 0xe32   : > { %v2079_v8 = vpop.eup %2078 }
 0xe33   : > { %v1213_v16 = vadd.f32 1.0, %v2079_v8 }
 0xe35   : > { %2080 = vrcp.f32 %v1213_v16  ;;  %v1225_v7 = vand.u32 2147483648, %v1213_v16  ;;  %vm1219_vm15 = vweird.f32 %v1213_v16  ;;  %v1223_v12 = vand.u32 2147483647, %v1213_v16  ;;  %v1495_v59 = vpop.f32.mrf.mxu2 }
 0xe37   : > { %v1226_v21 = vor.u32 1.1754944e-38, %v1225_v7  ;;  %vm1224_vm1 = vcmp.eq.f32.partialorder %v1223_v12, 8.507059e+37 }
 0xe3b   : > { %v2081_v13 = vpop.eup %2080 }
 0xe3c   : > { %v1215_v17 = vmul.f32 %v2081_v13, %v1213_v16  ;;  %vm1220_vm14 = vweird.f32 %v2081_v13  ;;  %v447_v16 = vpop.f32.mrf.mxu0 }
 0xe3d   : > { %vm1221_vm0 = vmor %vm1219_vm15, %vm1220_vm14 }
 0xe3e   : > { %v1216_v18 = vsub.f32 1.0, %v1215_v17 }
 0xe40   : > { %v1217_v1 = vmul.f32 %v2081_v13, %v1216_v18  ;;  %v2682_v18 = vld [vmem:[%s2769_s8] ss:$0 sm:$0xff] }
 0xe42   : > { %v1218_v4 = vadd.f32 %v2081_v13, %v1217_v1 }
 0xe44   : > { %v1222_v20 = vsel %vm1221_vm0, %v2081_v13, %v1218_v4 }
 0xe45   : > { %v1227_v23 = vsel %vm1224_vm1, %v1226_v21, %v1222_v20  ;;  %v1260_v28 = vpop.permute.xlu1 %1259 }
 0xe46   : > { %v1262_v31 = vsub.f32 %v2563_v51, %v1260_v28  ;;  %v2656_v51 = vld [vmem:[%s2767_s6] ss:$0 sm:$0xff] }
 0xe47   : > { %v1490_v53 = vadd.f32 %v2656_v51, %v1489_v50  ;;  %v1493_v57 = vadd.f32 %v2656_v51, %v1492_v55  ;;  %v1496_v60 = vadd.f32 %v2656_v51, %v1495_v59 }
 0xe48   : > { %v1273_v33 = vadd.f32 %v1271_v32, %v1262_v31 }
 0xe49   : > { %v1507_v54 = vmax.f32 %v1490_v53, 0.0  ;;  %v1508_v58 = vmax.f32 %v1493_v57, 0.0  ;;  %v1509_v61 = vmax.f32 %v1496_v60, 0.0 }
 0xe4a   : > { %v1274_v34 = vmul.f32 %v1273_v33, %v1227_v23 }
 0xea3   : > { %v1277_v22 = vpop.permute.xlu0 %1276 }
 0xea4   : > { %v1279_v24 = vmul.f32 %v1277_v22, %v1227_v23 }
 0xea6   : > { %1281 = vrot.lane.b32.xlu0 %v1279_v24, %s2224_s18 }
 0xf18   : > { %v1282_v35 = vpop.permute.xlu0 %1281 }
 0xf19   : > { %v2624_v36 = vadd.f32 %v1282_v35, %v1274_v34 }
 0xf1b   : > { %2082 = vtanh.f32 %v2624_v36  ;;  %1351 = vrot.lane.b32.xlu0 %v2624_v36, %s2225_s21 }
 0xf21   : > { %v2083_v37 = vpop.eup %2082 }
 0xf22   : > { %1287 = vrot.lane.b32.xlu1 %v2083_v37, %s2224_s18 }
 0xf2a   : > { %1385 = vperm.xlu1 %2009, %v1893_v25  }
 0xf8d   : > { %v1352_v42 = vpop.permute.xlu0 %1351 }
 0xf8e   : > { %1892 = vmatmul.msk.f32.vlgmr.msrb.gmra.mxu1 %vm468_vm3, %v1352_v42 }
 0xf94   : > { %v1288_v43 = vpop.permute.xlu1 %1287 }
 0xf95   : > { %v1290_v44 = vmul.f32 %v1288_v43, %v1227_v23 }
 0xf96   : > { %1894 = vmatmul.msk.f32.vlgmr.msra.gmra.mxu1 %vm468_vm3, %v1423_v45 }
 0xf97   : > { %1292 = vrot.lane.b32.xlu2 %v1290_v44, %s2226_s19 }
 0xf9c   : > { %v1386_v6 = vpop.permute.xlu1 %1385 }
 0xf9e   : > { %1895 = vmatmul.msk.f32.gmra.mxu1 %vm468_vm3, %v1424_v46 }
 0xfa6   : > { %1896 = vmatmul.msk.f32.gmra.mxu1 %vm468_vm3, %v1425_v47 }
 0xff1   : > { %v1293_v52 = vpop.permute.xlu2 %1292 }
 0xff2   : > { %1296 = vst.msk [vmem:[#allocation5 + $0x30] sm:$0xff] %vm468_vm3, %v1293_v52  ;;  %1890 = vmatmul.msk.f32.vlgmr.msra.gmra.mxu3 %vm468_vm3, %v1293_v52 }
 0xff9   : > { %v1429_v56 = vld [vmem:[#allocation5 + $0x30] sm:$0xff] }
 0xffa   : > { %1900 = vmatmul.msk.f32.gmra.mxu2 %vm468_vm3, %v1429_v56  ;;  %1905 = vmatmul.msk.f32.vlgmr.msrb.gmra.mxu3 %vm1518_vm2, %v1507_v54 }
0x1002   : > { %1906 = vmatmul.msk.f32.gmra.mxu3 %vm1518_vm2, %v1508_v58 }
0x100a   : > { %1907 = vmatmul.msk.f32.gmra.mxu3 %vm1518_vm2, %v1509_v61 }
0x100b   : > { %v1372_v62 = vpop.f32.mrf.mxu1 }
0x100c   : > { %v1373_v63 = vadd.f32 %v2456_v19, %v1372_v62 }
0x100e   : > { %2084 = vtanh.f32 %v1373_v63 }
0x1013   : > { %v1480_v0 = vpop.f32.mrf.mxu1 }
0x1014   : > { %v2085_v3 = vpop.eup %2084  ;;  %v1481_v9 = vadd.f32 %v2656_v51, %v1480_v0 }
0x1015   : > { %1379 = vrot.lane.b32.xlu0 %v2085_v3, %s2224_s18  ;;  %v1388_v10 = vmul.f32 %v2085_v3, %v1386_v6 }
0x1016   : > { %v1504_v11 = vmax.f32 %v1481_v9, 0.0 }
0x1017   : > { %1390 = vrot.lane.b32.xlu1 %v1388_v10, %s2224_s18 }
0x1018   : > { %1902 = vmatmul.msk.f32.vlgmr.msrb.gmra.mxu0 %vm1518_vm2, %v1504_v11 }
0x101b   : > { %v1483_v14 = vpop.f32.mrf.mxu1 }
0x101c   : > { %v1484_v15 = vadd.f32 %v2656_v51, %v1483_v14 }
0x101e   : > { %v1505_v2 = vmax.f32 %v1484_v15, 0.0 }
0x1020   : > { %1903 = vmatmul.msk.f32.gmra.mxu0 %vm1518_vm2, %v1505_v2 }
0x1023   : > { %v1486_v19 = vpop.f32.mrf.mxu1 }
0x1024   : > { %v1487_v5 = vadd.f32 %v2656_v51, %v1486_v19 }
0x1026   : > { %v1506_v8 = vmax.f32 %v1487_v5, 0.0 }
0x1028   : > { %1904 = vmatmul.msk.f32.gmra.mxu0 %vm1518_vm2, %v1506_v8 }
0x1075   : > { %v1320_v13 = vpop.f32.mrf.mxu3 }
0x1076   : > { %v2676_v17 = vadd.f32 %v1320_v13, %v447_v16 }
0x1078   : > { %2086 = vtanh.f32 %v2676_v17 }
0x107d   : > { %v1498_v1 = vpop.f32.mrf.mxu2  ;;  %v1569_v4 = vpop.f32.mrf.mxu3 }
0x107e   : > { %v2087_v7 = vpop.eup %2086  ;;  %v1499_v12 = vadd.f32 %v2656_v51, %v1498_v1  ;;  %v1570_v20 = vadd.f32 %v2682_v18, %v1569_v4 }
0x107f   : > { %1396 = vrot.lane.b32.xlu2 %v2087_v7, %s2224_s18 }
0x1080   : > { %v1510_v21 = vmax.f32 %v1499_v12, 0.0  ;;  %v1913_v22 = vmul.f32 -1.442695, %v1570_v20  ;;  %v1891_v20 = vmul.f32 -1.442695, %v2676_v17 }
0x1082   : > { %2088 = vpow2.f32 %v1913_v22  ;;  %1908 = vmatmul.msk.f32.gmra.mxu3 %vm1518_vm2, %v1510_v21 }
0x1085   : > { %v1572_v23 = vpop.f32.mrf.mxu3 }
0x1086   : > { %v1573_v24 = vadd.f32 %v2682_v18, %v1572_v23 }
0x1088   : > { %v2089_v25 = vpop.eup %2088  ;;  %v1914_v26 = vmul.f32 -1.442695, %v1573_v24 }
0x1089   : > { %v1611_v27 = vadd.f32 1.0, %v2089_v25 }
0x108a   : > { %2090 = vpow2.f32 %v1914_v26 }
0x108b   : > { %2092 = vrcp.f32 %v1611_v27  ;;  %v1672_v37 = vand.u32 2147483648, %v1611_v27  ;;  %v1670_v40 = vand.u32 2147483647, %v1611_v27  ;;  %vm1666_vm5 = vweird.f32 %v1611_v27 }
0x108d   : > { %v1575_v28 = vpop.f32.mrf.mxu3  ;;  %v1673_v46 = vor.u32 1.1754944e-38, %v1672_v37  ;;  %vm1671_vm7 = vcmp.eq.f32.partialorder %v1670_v40, 8.507059e+37 }
0x108e   : > { %v1576_v29 = vadd.f32 %v2682_v18, %v1575_v28 }
0x1090   : > { %v2091_v30 = vpop.eup %2090  ;;  %v1915_v31 = vmul.f32 -1.442695, %v1576_v29 }
0x1091   : > { %v2093_v32 = vpop.eup %2092  ;;  %v1612_v33 = vadd.f32 1.0, %v2091_v30 }
0x1092   : > { %v1662_v34 = vmul.f32 %v2093_v32, %v1611_v27  ;;  %2094 = vpow2.f32 %v1915_v31  ;;  %vm1667_vm4 = vweird.f32 %v2093_v32 }
0x1093   : > { %2096 = vrcp.f32 %v1612_v33  ;;  %vm1668_vm6 = vmor %vm1666_vm5, %vm1667_vm4  ;;  %v1687_v53 = vand.u32 2147483648, %v1612_v33  ;;  %v1685_v56 = vand.u32 2147483647, %v1612_v33  ;;  %vm1681_vm9 = vweird.f32 %v1612_v33 }
0x1094   : > { %v1663_v35 = vsub.f32 1.0, %v1662_v34 }
0x1095   : > { %v1560_v38 = vpop.f32.mrf.mxu0  ;;  %v1688_v62 = vor.u32 1.1754944e-38, %v1687_v53  ;;  %vm1686_vm11 = vcmp.eq.f32.partialorder %v1685_v56, 8.507059e+37 }
0x1096   : > { %v1664_v39 = vmul.f32 %v2093_v32, %v1663_v35  ;;  %v1561_v41 = vadd.f32 %v2682_v18, %v1560_v38 }
0x1098   : > { %v2095_v42 = vpop.eup %2094  ;;  %v1665_v43 = vadd.f32 %v2093_v32, %v1664_v39  ;;  %v1910_v44 = vmul.f32 -1.442695, %v1561_v41 }
0x1099   : > { %v2097_v45 = vpop.eup %2096  ;;  %v1613_v47 = vadd.f32 1.0, %v2095_v42 }
0x109a   : > { %v1669_v48 = vsel %vm1668_vm6, %v2093_v32, %v1665_v43  ;;  %v1677_v49 = vmul.f32 %v2097_v45, %v1612_v33  ;;  %2098 = vpow2.f32 %v1910_v44  ;;  %vm1682_vm8 = vweird.f32 %v2097_v45 }
0x109b   : > { %v1674_v50 = vsel %vm1671_vm7, %v1673_v46, %v1669_v48  ;;  %2100 = vrcp.f32 %v1613_v47  ;;  %vm1683_vm10 = vmor %vm1681_vm9, %vm1682_vm8  ;;  %v1702_v10 = vand.u32 2147483648, %v1613_v47  ;;  %v1700_v15 = vand.u32 2147483647, %v1613_v47 }
0x109c   : > { %1739 = vst [vmem:[%s2365_s14 + $0x18] sm:$0xff] %v1674_v50  ;;  %v1678_v52 = vsub.f32 1.0, %v1677_v49  ;;  %vm1696_vm13 = vweird.f32 %v1613_v47 }
0x109d   : > { %v1563_v54 = vpop.f32.mrf.mxu0  ;;  %v1703_v13 = vor.u32 1.1754944e-38, %v1702_v10  ;;  %vm1701_vm15 = vcmp.eq.f32.partialorder %v1700_v15, 8.507059e+37 }
0x109e   : > { %v1679_v55 = vmul.f32 %v2097_v45, %v1678_v52  ;;  %v1564_v57 = vadd.f32 %v2682_v18, %v1563_v54 }
0x10a0   : > { %v2099_v58 = vpop.eup %2098  ;;  %v1680_v59 = vadd.f32 %v2097_v45, %v1679_v55  ;;  %v1911_v60 = vmul.f32 -1.442695, %v1564_v57 }
0x10a1   : > { %v2101_v61 = vpop.eup %2100  ;;  %v1608_v63 = vadd.f32 1.0, %v2099_v58 }
0x10a2   : > { %v1684_v0 = vsel %vm1683_vm10, %v2097_v45, %v1680_v59  ;;  %v1692_v3 = vmul.f32 %v2101_v61, %v1613_v47  ;;  %2102 = vpow2.f32 %v1911_v60  ;;  %vm1697_vm12 = vweird.f32 %v2101_v61 }
0x10a3   : > { %v1689_v6 = vsel %vm1686_vm11, %v1688_v62, %v1684_v0  ;;  %2104 = vrcp.f32 %v1608_v63  ;;  %vm1698_vm14 = vmor %vm1696_vm13, %vm1697_vm12  ;;  %v1627_v22 = vand.u32 2147483648, %v1608_v63  ;;  %v1625_v24 = vand.u32 2147483647, %v1608_v63 }
0x10a4   : > { %1740 = vst [vmem:[%s2365_s14 + $0x20] sm:$0xff] %v1689_v6  ;;  %v1693_v9 = vsub.f32 1.0, %v1692_v3  ;;  %vm1621_vm1 = vweird.f32 %v1608_v63 }
0x10a5   : > { %v1566_v11 = vpop.f32.mrf.mxu0  ;;  %v1628_v28 = vor.u32 1.1754944e-38, %v1627_v22  ;;  %vm1626_vm5 = vcmp.eq.f32.partialorder %v1625_v24, 8.507059e+37 }
0x10a6   : > { %v1694_v14 = vmul.f32 %v2101_v61, %v1693_v9  ;;  %v1567_v2 = vadd.f32 %v2682_v18, %v1566_v11 }
0x10a8   : > { %v2103_v19 = vpop.eup %2102  ;;  %v1695_v5 = vadd.f32 %v2101_v61, %v1694_v14  ;;  %v1912_v8 = vmul.f32 -1.442695, %v1567_v2 }
0x10a9   : > { %v2105_v16 = vpop.eup %2104  ;;  %v1609_v1 = vadd.f32 1.0, %v2103_v19 }
0x10aa   : > { %v1699_v4 = vsel %vm1698_vm14, %v2101_v61, %v1695_v5  ;;  %v1617_v7 = vmul.f32 %v2105_v16, %v1608_v63  ;;  %2106 = vpow2.f32 %v1912_v8  ;;  %vm1622_vm0 = vweird.f32 %v2105_v16 }
0x10ab   : > { %v1704_v12 = vsel %vm1701_vm15, %v1703_v13, %v1699_v4  ;;  %2108 = vrcp.f32 %v1609_v1  ;;  %vm1623_vm4 = vmor %vm1621_vm1, %vm1622_vm0  ;;  %v1642_v33 = vand.u32 2147483648, %v1609_v1  ;;  %v1640_v37 = vand.u32 2147483647, %v1609_v1 }
0x10ac   : > { %1741 = vst [vmem:[%s2365_s14 + $0x28] sm:$0xff] %v1704_v12  ;;  %v1618_v21 = vsub.f32 1.0, %v1617_v7  ;;  %2110 = vpow2.f32 %v1891_v20  ;;  %vm1636_vm7 = vweird.f32 %v1609_v1  ;;  %v1380_v12 = vpop.permute.xlu0 %1379 }
0x10ad   : > { %v1643_v41 = vor.u32 1.1754944e-38, %v1642_v33  ;;  %vm1641_vm9 = vcmp.eq.f32.partialorder %v1640_v37, 8.507059e+37  ;;  %v1382_v20 = vsub.f32 %v2624_v36, %v1380_v12 }
0x10ae   : > { %v1619_v23 = vmul.f32 %v2105_v16, %v1618_v21  ;;  %v1391_v21 = vpop.permute.xlu1 %1390 }
0x10af   : > { %v1393_v22 = vadd.f32 %v1391_v21, %v1382_v20 }
0x10b0   : > { %v2107_v25 = vpop.eup %2106  ;;  %v1620_v26 = vadd.f32 %v2105_v16, %v1619_v23 }
0x10b1   : > { %v2109_v27 = vpop.eup %2108  ;;  %v1610_v29 = vadd.f32 1.0, %v2107_v25 }
0x10b2   : > { %v1624_v30 = vsel %vm1623_vm4, %v2105_v16, %v1620_v26  ;;  %v1632_v31 = vmul.f32 %v2109_v27, %v1609_v1  ;;  %v2111_v34 = vpop.eup %2110  ;;  %vm1637_vm6 = vweird.f32 %v2109_v27 }
0x10b3   : > { %v1629_v32 = vsel %vm1626_vm5, %v1628_v28, %v1624_v30  ;;  %2112 = vrcp.f32 %v1610_v29  ;;  %v1333_v40 = vadd.f32 1.0, %v2111_v34  ;;  %vm1638_vm8 = vmor %vm1636_vm7, %vm1637_vm6  ;;  %v1657_v46 = vand.u32 2147483648, %v1610_v29 }
0x10b4   : > { %1736 = vst [vmem:[%s2365_s14] sm:$0xff] %v1629_v32  ;;  %v1633_v17 = vsub.f32 1.0, %v1632_v31  ;;  %v1655_v48 = vand.u32 2147483647, %v1610_v29  ;;  %vm1651_vm11 = vweird.f32 %v1610_v29 }
0x10b5   : > { %2114 = vrcp.f32 %v1333_v40  ;;  %v1658_v50 = vor.u32 1.1754944e-38, %v1657_v46  ;;  %v1345_v59 = vand.u32 2147483648, %v1333_v40  ;;  %vm1339_vm15 = vweird.f32 %v1333_v40 }
0x10b6   : > { %v1634_v35 = vmul.f32 %v2109_v27, %v1633_v17  ;;  %vm1656_vm13 = vcmp.eq.f32.partialorder %v1655_v48, 8.507059e+37  ;;  %v1343_v60 = vand.u32 2147483647, %v1333_v40 }
0x10b7   : > { %v1346_v62 = vor.u32 1.1754944e-38, %v1345_v59 }
0x10b8   : > { %v1635_v38 = vadd.f32 %v2109_v27, %v1634_v35  ;;  %vm1344_vm1 = vcmp.eq.f32.partialorder %v1343_v60, 8.507059e+37 }
0x10b9   : > { %v2113_v39 = vpop.eup %2112 }
0x10ba   : > { %v1639_v42 = vsel %vm1638_vm8, %v2109_v27, %v1635_v38  ;;  %v1647_v43 = vmul.f32 %v2113_v39, %v1610_v29  ;;  %vm1652_vm10 = vweird.f32 %v2113_v39 }
0x10bb   : > { %v1644_v44 = vsel %vm1641_vm9, %v1643_v41, %v1639_v42  ;;  %vm1653_vm12 = vmor %vm1651_vm11, %vm1652_vm10  ;;  %v2115_v53 = vpop.eup %2114 }
0x10bc   : > { %1737 = vst [vmem:[%s2365_s14 + $0x8] sm:$0xff] %v1644_v44  ;;  %v1648_v45 = vsub.f32 1.0, %v1647_v43  ;;  %v1335_v55 = vmul.f32 %v2115_v53, %v1333_v40  ;;  %vm1340_vm14 = vweird.f32 %v2115_v53 }
0x10bd   : > { %vm1341_vm0 = vmor %vm1339_vm15, %vm1340_vm14 }
0x10be   : > { %v1649_v47 = vmul.f32 %v2113_v39, %v1648_v45  ;;  %v1336_v56 = vsub.f32 1.0, %v1335_v55 }
0x10c0   : > { %v1650_v49 = vadd.f32 %v2113_v39, %v1649_v47  ;;  %v1337_v57 = vmul.f32 %v2115_v53, %v1336_v56 }
0x10c2   : > { %v1654_v52 = vsel %vm1653_vm12, %v2113_v39, %v1650_v49  ;;  %v1338_v58 = vadd.f32 %v2115_v53, %v1337_v57 }
0x10c3   : > { %v1659_v54 = vsel %vm1656_vm13, %v1658_v50, %v1654_v52 }
0x10c4   : > { %1738 = vst [vmem:[%s2365_s14 + $0x10] sm:$0xff] %v1659_v54  ;;  %v1342_v61 = vsel %vm1341_vm0, %v2115_v53, %v1338_v58 }
0x10c5   : > { %v1347_v0 = vsel %vm1344_vm1, %v1346_v62, %v1342_v61 }
0x10c6   : > { %v1394_v23 = vmul.f32 %v1393_v22, %v1347_v0 }
0x10d9   : > { %v1397_v63 = vpop.permute.xlu2 %1396 }
0x10da   : > { %v1399_v3 = vmul.f32 %v1397_v63, %v1347_v0 }
0x10dc   : > { %1401 = vrot.lane.b32.xlu2 %v1399_v3, %s2224_s18 }
0x1105   : > { %v1578_v6 = vpop.f32.mrf.mxu3 }
0x1106   : > { %v1579_v9 = vadd.f32 %v2682_v18, %v1578_v6 }
0x1108   : > { %v1916_v10 = vmul.f32 -1.442695, %v1579_v9 }
0x110a   : > { %2116 = vpow2.f32 %v1916_v10 }
0x1110   : > { %v2117_v11 = vpop.eup %2116 }
0x1111   : > { %v1614_v14 = vadd.f32 1.0, %v2117_v11 }
0x1113   : > { %2118 = vrcp.f32 %v1614_v14  ;;  %v1717_v5 = vand.u32 2147483648, %v1614_v14  ;;  %v1715_v16 = vand.u32 2147483647, %v1614_v14  ;;  %vm1711_vm5 = vweird.f32 %v1614_v14 }
0x1115   : > { %v1718_v1 = vor.u32 1.1754944e-38, %v1717_v5  ;;  %vm1716_vm7 = vcmp.eq.f32.partialorder %v1715_v16, 8.507059e+37 }
0x1119   : > { %v2119_v15 = vpop.eup %2118 }
0x111a   : > { %v1707_v2 = vmul.f32 %v2119_v15, %v1614_v14  ;;  %vm1712_vm4 = vweird.f32 %v2119_v15 }
0x111b   : > { %vm1713_vm6 = vmor %vm1711_vm5, %vm1712_vm4 }
0x111c   : > { %v1708_v19 = vsub.f32 1.0, %v1707_v2 }
0x111e   : > { %v1709_v8 = vmul.f32 %v2119_v15, %v1708_v19 }
0x1120   : > { %v1710_v13 = vadd.f32 %v2119_v15, %v1709_v8 }
0x1122   : > { %v1714_v4 = vsel %vm1713_vm6, %v2119_v15, %v1710_v13 }
0x1123   : > { %v1719_v7 = vsel %vm1716_vm7, %v1718_v1, %v1714_v4 }
0x1124   : > { %1742 = vst [vmem:[%s2365_s14 + $0x30] sm:$0xff] %v1719_v7 }
0x1136   : > { %v1402_v24 = vpop.permute.xlu2 %1401 }
0x1137   : > { %v1404_v25 = vadd.f32 %v1402_v24, %v1394_v23 }
0x1139   : > { %2120 = vtanh.f32 %v1404_v25  ;;  %1419 = vrot.lane.b32.xlu2 %v1404_v25, %s2225_s21 }
0x113f   : > { %v2121_v26 = vpop.eup %2120 }
0x1140   : > { %1407 = vrot.lane.b32.xlu0 %v2121_v26, %s2224_s18  ;;  %s1920_s18 = sshll.u32 %s2208_s13, 4  ;;  %s2783_s13 = sand.u32 1, %s2196_s10  }
0x1141   : > { %s1756_s21 = sadd.s32 %s1920_s18, %s2352_s29  ;;  %s1745_s29 = scalar_lea.sflag [#allocation7], %s2783_s13 }
0x1142   : > { %s2146_s18 = scalar_lea.hbm %s2770_s9, 256 }
0x1193   : > { %v1420_v27 = vpop.permute.xlu2 %1419 }
0x1194   : > { %1422 = vst.msk [vmem:[#allocation3] sm:$0xff] %vm468_vm3, %v1420_v27 }
0x11b2   : > { %v1408_v28 = vpop.permute.xlu0 %1407 }
0x11b3   : > { %v1410_v29 = vmul.f32 %v1408_v28, %v1347_v0 }
0x11b5   : > { %1412 = vrot.lane.b32.xlu1 %v1410_v29, %s2226_s19  ;;  %s1921_s19 = sshll.u32 %s1756_s21, 3 }
0x11b6   : > { %s1758_s15 = scalar_lea.hbm %s2770_s9, %s1921_s19 }
0x11b7   : > { %s1761_s12 = sshll.u32 %s1758_s15, 4  ;;  %s1762_s12 = int_to_ptr.hbm [resolvable:$true] %s1761_s12 }
0x11b8   : > { %s2140_s17 = sshra.s32 %s1762_s12, 4  ;;  %s2141_s17 = int_to_ptr.hbm [resolvable:$true] %s2140_s17 }
0x11b9   : > { %s2142_s27 = scalar_lea.hbm %s2141_s17, 64  ;;  %p2147_p5 = scmp.lt.s32.totalorder %s2141_s17, %s2770_s9 }
0x11ba   : > { %p2143_p1 = scmp.ne.s32.totalorder %s2141_s17, %s2142_s27  ;;  %p2148_p6 = scmp.lt.s32.totalorder %s2146_s18, %s2142_s27 }
0x11bc   : > { %p2144_p2 = pnand %p2143_p1, %p2330_p3  ;;  %p2149_p7 = por %p2148_p6, %p2147_p5 }
0x11be   : > { %p2145_p4 = pneg %p2144_p2 }
0x11c0   : > { %p2150_p9 = pnand %p2149_p7, %p2145_p4 }
0x1227   : > { %v1413_v36 = vpop.permute.xlu1 %1412 }
0x1228   : > { %1416 = vst.msk [vmem:[#allocation5 + $0x38] sm:$0xff] %vm468_vm3, %v1413_v36 }
0x1229   : > { %1417 = vst.msk [vmem:[#allocation2] sm:$0xff] %vm468_vm3, %v1413_v36 }
0x122f   : > { %v1430_v30 = vld [vmem:[#allocation5 + $0x38] sm:$0xff] }
0x1230   : > { %1901 = vmatmul.msk.f32.gmra.mxu2 %vm468_vm3, %v1430_v30 }
0x12b3   : > { %v1501_v31 = vpop.f32.mrf.mxu2 }
0x12b4   : > { %v1502_v32 = vadd.f32 %v2656_v51, %v1501_v31 }
0x12b6   : > { %v1511_v17 = vmax.f32 %v1502_v32, 0.0 }
0x12b8   : > { %1909 = vmatmul.msk.f32.gmra.mxu3 %vm1518_vm2, %v1511_v17 }
0x133b   : > { %v1581_v33 = vpop.f32.mrf.mxu3 }
0x133c   : > { %v1582_v34 = vadd.f32 %v2682_v18, %v1581_v33 }
0x133e   : > { %v1917_v35 = vmul.f32 -1.442695, %v1582_v34 }
0x1340   : > { %2122 = vpow2.f32 %v1917_v35 }
0x1346   : > { %v2123_v37 = vpop.eup %2122 }
0x1347   : > { %v1615_v38 = vadd.f32 1.0, %v2123_v37 }
0x1349   : > { %2124 = vrcp.f32 %v1615_v38  ;;  %v1732_v41 = vand.u32 2147483648, %v1615_v38  ;;  %v1730_v42 = vand.u32 2147483647, %v1615_v38  ;;  %vm1726_vm2 = vweird.f32 %v1615_v38 }
0x134b   : > { %v1733_v44 = vor.u32 1.1754944e-38, %v1732_v41  ;;  %vm1731_vm9 = vcmp.eq.f32.partialorder %v1730_v42, 8.507059e+37 }
0x134f   : > { %v2125_v39 = vpop.eup %2124 }
0x1350   : > { %v1722_v40 = vmul.f32 %v2125_v39, %v1615_v38  ;;  %vm1727_vm3 = vweird.f32 %v2125_v39 }
0x1351   : > { %vm1728_vm8 = vmor %vm1726_vm2, %vm1727_vm3 }
0x1352   : > { %v1723_v51 = vsub.f32 1.0, %v1722_v40 }
0x1354   : > { %v1724_v18 = vmul.f32 %v2125_v39, %v1723_v51 }
0x1356   : > { %v1725_v43 = vadd.f32 %v2125_v39, %v1724_v18 }
0x1358   : > { %v1729_v45 = vsel %vm1728_vm8, %v2125_v39, %v1725_v43 }
0x1359   : > { %v1734_v46 = vsel %vm1731_vm9, %v1733_v44, %v1729_v45 }
0x135a   : > { %1743 = vst [vmem:[%s2365_s14 + $0x38] sm:$0xff] %v1734_v46 }
0x135b   : > { %2153 = shalt.err (!%p2150_p9)
}
0x135c   : > { %s2227_s14 = smov 128   ;;  %s2228_s25 = smov 8  }
0x135d   : > { %1930 = dma.vmem_to_hbm [thread:$0]  (%p2330_p3), %s1760_s20, 1024, %s1762_s12, %s1745_s29, %s2227_s14, %s2227_s14, %s2228_s25  }
0x135e PF: > { %p1936_p10 = scmp.ge.s32.totalorder %s2220_s16, 2  ;;  %s1776_s26 = sand.u32 1, %s2192_s30  }
0x135f   : > { %s1777_s15 = scalar_lea.sflag [#allocation7], %s1776_s26 }
0x1360   : > { %p1933_p11 = pnand %p1936_p10, %p2339_p8 }
0x1362   : > { %p1934_p12 = pneg %p1933_p11 }
0x1364   : > { %2187 = dma.done.wait (%p1934_p12), %s1777_s15, 1024  }
0x1365   : > { %2189 = vsyncadd (%p1934_p12), %s1777_s15, 4294966272  ;;  %s22_s16 = sadd.s32 1, %s2220_s16   ;;  %s2784_s13 = sld [smem:[#allocation13_spill]] }
0x1366   : > { %p19_p13 = scmp.ge.s32.totalorder %s22_s16, 6   ;;  %s2785_s12 = sld [smem:[#allocation9_spill]] }
0x1367   : > { %s2786_s22 = sld [smem:[#allocation10_spill]]  ;;  %s2789_s30 = smov %s2196_s10 }
0x1368   : > { %s2787_s14 = sld [smem:[#allocation11_spill]]  ;;  %s2790_s10 = smov %s2200_s11 }
0x1369   : > { %s2788_s15 = sld [smem:[#allocation12_spill]]  ;;  %21 = sbr.rel (!%p19_p13) target bundleno = 5 (0x5), region = 116 }
0x136b   : > { %s2791_s11 = smov %s2784_s13 }
0x136d   : > { %s2792_s13 = smov %s2786_s22 }
0x136e   :  { %1783 = vsyncpa [#allocation7], 1 }
0x136f   :  { %1785 = vsyncpa [#allocation7 + $0x1], 1 }

</bundles_post_ra>
